<compile_context>
chip_gen: v6e
topology: v6e:2x2x1
jax: 0.10.0
libtpu: 0.0.40
codegen_flags: <defaults>
</compile_context>

<pallas_src>
import math

import jax
import jax.numpy as jnp
from jax.experimental import pallas as pl
from jax.experimental.pallas import tpu as pltpu

LAT_PAD = 128   # lane-aligned offset of the fc1-X block inside the fused first-pass weight


def _make_mlpom_kernel(latent_dim, hidden_dim, out_dim, apply_tanh):
    """Kernel body closed over static dims and the (static) out_fn choice."""

    def kernel(x_ref, wxf_ref, wom2_ref, w1h_ref, w2_ref, w3_ref, b_ref, out_ref):
        xb = x_ref[...].astype(jnp.bfloat16)    # (TB, IN); no-op if x already bf16
        b = b_ref[...]                          # (8, 128)  f32 packed biases

        # Fused first pass: [fcom1 | fc1_x] share the LHS X -> one MXU push.
        xf = jnp.dot(xb, wxf_ref[...], preferred_element_type=jnp.float32)
        h0 = jnp.maximum(xf[:, :latent_dim] + b[0:1, :latent_dim], 0.0)   # relu(fcom1(X))
        pre1_x = xf[:, LAT_PAD:LAT_PAD + hidden_dim]                      # X @ W1x (bias later)

        # h_1m = relu(fcom2(h_0m))
        h1m = jnp.maximum(
            jnp.dot(h0.astype(jnp.bfloat16), wom2_ref[...],
                    preferred_element_type=jnp.float32) + b[1:2, :latent_dim],
            0.0)

        # h1 = relu(fc1(concat([X, h_1m]))) == relu(X @ W1x + h_1m @ W1h + b1)
        h1 = jnp.maximum(
            pre1_x
            + jnp.dot(h1m.astype(jnp.bfloat16), w1h_ref[...],
                      preferred_element_type=jnp.float32)
            + b[2:3, :hidden_dim],
            0.0)

        # h2 = relu(fc2(h1))
        h2 = jnp.maximum(
            jnp.dot(h1.astype(jnp.bfloat16), w2_ref[...],
                    preferred_element_type=jnp.float32) + b[3:4, :hidden_dim],
            0.0)

        # out = out_fn(fc3(h2)); narrow (out_dim-lane) result stored directly.
        out = jnp.dot(h2.astype(jnp.bfloat16), w3_ref[...],
                      preferred_element_type=jnp.float32) + b[4:5, :out_dim]
        if apply_tanh:                          # constrain_out and not discrete_action
            out = jnp.tanh(out)
        out_ref[...] = out.astype(out_ref.dtype)

    return kernel


def init_params(key, input_dim, out_dim, hidden_dim=64, latent_dim=16):
    """torch.nn.Linear-style init: U(-1/sqrt(fan_in), 1/sqrt(fan_in)); weights stored [in, out]."""
    ks = jax.random.split(key, 10)

    def linear(kw, kb, fan_in, fan_out):
        bound = 1.0 / math.sqrt(fan_in)
        w = jax.random.uniform(kw, (fan_in, fan_out), jnp.float32, -bound, bound)
        b = jax.random.uniform(kb, (fan_out,), jnp.float32, -bound, bound)
        return w, b

    wom1, bom1 = linear(ks[0], ks[1], input_dim, latent_dim)
    wom2, bom2 = linear(ks[2], ks[3], latent_dim, latent_dim)
    w1, b1 = linear(ks[4], ks[5], input_dim + latent_dim, hidden_dim)
    w2, b2 = linear(ks[6], ks[7], hidden_dim, hidden_dim)
    w3, b3 = linear(ks[8], ks[9], hidden_dim, out_dim)
    return (wom1, bom1, wom2, bom2, w1, b1, w2, b2, w3, b3)


def prepare_params(raw):
    """One-time packing: fused bf16 weights + one (8,128) f32 bias tile."""
    wom1, bom1, wom2, bom2, w1, b1, w2, b2, w3, b3 = raw
    in_dim, latent_dim = wom1.shape
    hidden_dim = w2.shape[0]
    out_dim = w3.shape[1]
    assert latent_dim <= LAT_PAD and hidden_dim <= 128 and out_dim <= 128

    # fused [fcom1 | fc1_x] weight, lane-aligned blocks: cols [0:lat] and [128:128+hid]
    wxf = jnp.zeros((in_dim, LAT_PAD + hidden_dim), jnp.float32)
    wxf = wxf.at[:, :latent_dim].set(wom1)
    wxf = wxf.at[:, LAT_PAD:LAT_PAD + hidden_dim].set(w1[:in_dim, :])
    wxf = wxf.astype(jnp.bfloat16)

    w1h = w1[in_dim:, :].astype(jnp.bfloat16)        # fc1 rows for h_1m (latent -> hidden)
    wom2_b = wom2.astype(jnp.bfloat16)
    w2_b = w2.astype(jnp.bfloat16)
    w3_b = w3.astype(jnp.bfloat16)                   # (hidden, out_dim), no lane padding

    bpack = jnp.zeros((8, 128), jnp.float32)
    bpack = bpack.at[0, :latent_dim].set(bom1)
    bpack = bpack.at[1, :latent_dim].set(bom2)
    bpack = bpack.at[2, :hidden_dim].set(b1)
    bpack = bpack.at[3, :hidden_dim].set(b2)
    bpack = bpack.at[4, :out_dim].set(b3)

    dims = dict(in_dim=in_dim, latent_dim=latent_dim,
                hidden_dim=hidden_dim, out_dim=out_dim)
    return (wxf, wom2_b, w1h, w2_b, w3_b, bpack), dims


def _choose_tile_b(B, tile_b, sublane):
    """Batch-tile picker: big tiles (amortize step overhead), never a 1-step grid
    when the batch is splittable (keeps both v7x TensorCores busy)."""
    tb = min(tile_b, B)
    if tb >= B and B >= 2 * sublane:
        tb = -(-B // 2)                       # ceil(B / 2) -> grid of 2
    if tb < B:
        tb = max(sublane, (tb // sublane) * sublane)   # sublane-aligned block
    else:
        tb = B                                # block == full dim is always legal
    return tb


def mlpom_forward(x, packed, dims, *, tile_b=8192,
                  constrain_out=False, discrete_action=True,
                  out_dtype=jnp.float32, deep_buffer=False):
    wxf, wom2, w1h, w2, w3, bpack = packed
    in_dim, lat = dims["in_dim"], dims["latent_dim"]
    hid, out_dim = dims["hidden_dim"], dims["out_dim"]

    B = x.shape[0]
    sublane = 16 if x.dtype == jnp.bfloat16 else 8
    tb = _choose_tile_b(B, tile_b, sublane)
    grid = (pl.cdiv(B, tb),)

    kernel = _make_mlpom_kernel(
        lat, hid, out_dim, apply_tanh=(constrain_out and not discrete_action))

    if deep_buffer:
        # v7x: deeper buffering on the streamed arrays (weights stay resident anyway).
        x_spec = pl.BlockSpec((tb, in_dim), lambda i: (i, 0),
                              pipeline_mode=pl.Buffered(3))
        out_spec = pl.BlockSpec((tb, out_dim), lambda i: (i, 0),
                                pipeline_mode=pl.Buffered(3))
    else:
        x_spec = pl.BlockSpec((tb, in_dim), lambda i: (i, 0))
        out_spec = pl.BlockSpec((tb, out_dim), lambda i: (i, 0))

    grid_spec = pltpu.PrefetchScalarGridSpec(
        num_scalar_prefetch=0,
        grid=grid,
        in_specs=[
            x_spec,                                                   # x: batch-tiled
            pl.BlockSpec((in_dim, LAT_PAD + hid), lambda i: (0, 0)),  # fused [fcom1 | fc1_x]
            pl.BlockSpec((lat, lat), lambda i: (0, 0)),               # fcom2
            pl.BlockSpec((lat, hid), lambda i: (0, 0)),               # fc1 (h_1m half)
            pl.BlockSpec((hid, hid), lambda i: (0, 0)),               # fc2
            pl.BlockSpec((hid, out_dim), lambda i: (0, 0)),           # fc3
            pl.BlockSpec((8, 128), lambda i: (0, 0)),                 # packed biases
        ],
        out_specs=out_spec,
    )

    return pl.pallas_call(
        kernel,
        out_shape=jax.ShapeDtypeStruct((B, out_dim), out_dtype),
        grid_spec=grid_spec,
        compiler_params=pltpu.CompilerParams(dimension_semantics=("parallel",)),
    )(x, wxf, wom2, w1h, w2, w3, bpack)


def mlpom_reference(x, raw, *, constrain_out=False, discrete_action=True):
    """Pure-JAX f32 reference of MLPOMNetwork.forward (norm_in=False path)."""
    wom1, bom1, wom2, bom2, w1, b1, w2, b2, w3, b3 = raw
    relu = jax.nn.relu
    h0 = relu(x @ wom1 + bom1)
    h1m = relu(h0 @ wom2 + bom2)
    comb = jnp.concatenate([x, h1m], axis=1)
    h1 = relu(comb @ w1 + b1)
    h2 = relu(h1 @ w2 + b2)
    out = h2 @ w3 + b3
    if constrain_out and not discrete_action:
        out = jnp.tanh(out)
    return out


if __name__ == "__main__":
    key = jax.random.PRNGKey(0)
    k_param, k_x = jax.random.split(key)

    B, INPUT_DIM, OUT_DIM, HIDDEN_DIM, LATENT_DIM = 512, 16, 8, 64, 16

    raw = init_params(k_param, INPUT_DIM, OUT_DIM, HIDDEN_DIM, LATENT_DIM)
    packed, dims = prepare_params(raw)
    x = jax.random.normal(k_x, (B, INPUT_DIM), jnp.float32)

    ref = mlpom_reference(x, raw)

    # Default tiling: at B=512 this resolves to a 2-step "parallel" batch grid
    # (both v7x TensorCores busy); at production batch sizes the 8192-row tiles
    # amortize the ~0.35 us/step pipeline overhead.
    out = mlpom_forward(x, packed, dims)
    jax.block_until_ready(out)
    assert out.shape == (B, OUT_DIM)
    max_err = float(jnp.max(jnp.abs(out - ref)))
    assert max_err < 0.1, f"mismatch vs f32 reference: max_err={max_err}"

    # Smaller tile -> 4-step pipelined grid at these shapes.
    out_small = mlpom_forward(x, packed, dims, tile_b=128)
    jax.block_until_ready(out_small)
    assert float(jnp.max(jnp.abs(out_small - ref))) < 0.1

    # Ragged batch (partial trailing block) to exercise the masked read/write path.
    Br = 472
    out_ragged = mlpom_forward(x[:Br], packed, dims, tile_b=128)
    jax.block_until_ready(out_ragged)
    assert out_ragged.shape == (Br, OUT_DIM)
    assert float(jnp.max(jnp.abs(out_ragged - ref[:Br]))) < 0.1

    print("KERNEL_OK")
</pallas_src>

<mosaic_0001>
module attributes {stable_mosaic.version = 11 : i64} {
  func.func @kernel(%arg0: i32, %arg1: memref<256x16xf32, #tpu.memory_space<vmem>>, %arg2: memref<16x192xbf16, #tpu.memory_space<vmem>>, %arg3: memref<16x16xbf16, #tpu.memory_space<vmem>>, %arg4: memref<16x64xbf16, #tpu.memory_space<vmem>>, %arg5: memref<64x64xbf16, #tpu.memory_space<vmem>>, %arg6: memref<64x8xbf16, #tpu.memory_space<vmem>>, %arg7: memref<8x128xf32, #tpu.memory_space<vmem>>, %arg8: memref<256x8xf32, #tpu.memory_space<vmem>>) attributes {dimension_semantics = [#tpu.dimension_semantics<parallel>], iteration_bounds = array<i64: 2>, scalar_prefetch = 0 : i64, scratch_operands = 0 : i64, tpu.core_type = #tpu.core_type<tc>, window_params = [{transform_indices = @transform_0, window_bounds = array<i64: 256, 16>}, {pipeline_mode = #tpu.pipeline_mode<synchronous>, transform_indices = @transform_1, window_bounds = array<i64: 16, 192>}, {pipeline_mode = #tpu.pipeline_mode<synchronous>, transform_indices = @transform_2, window_bounds = array<i64: 16, 16>}, {pipeline_mode = #tpu.pipeline_mode<synchronous>, transform_indices = @transform_3, window_bounds = array<i64: 16, 64>}, {pipeline_mode = #tpu.pipeline_mode<synchronous>, transform_indices = @transform_4, window_bounds = array<i64: 64, 64>}, {pipeline_mode = #tpu.pipeline_mode<synchronous>, transform_indices = @transform_5, window_bounds = array<i64: 64, 8>}, {pipeline_mode = #tpu.pipeline_mode<synchronous>, transform_indices = @transform_6, window_bounds = array<i64: 8, 128>}, {transform_indices = @transform_7, window_bounds = array<i64: 256, 8>}]} {
    %c0 = arith.constant 0 : index
    %c0_0 = arith.constant 0 : index
    %0 = vector.load %arg1[%c0, %c0_0] : memref<256x16xf32, #tpu.memory_space<vmem>>, vector<256x16xf32>
    %1 = arith.truncf %0 : vector<256x16xf32> to vector<256x16xbf16>
    %c0_1 = arith.constant 0 : index
    %c0_2 = arith.constant 0 : index
    %2 = vector.load %arg7[%c0_1, %c0_2] : memref<8x128xf32, #tpu.memory_space<vmem>>, vector<8x128xf32>
    %c0_3 = arith.constant 0 : index
    %c0_4 = arith.constant 0 : index
    %3 = vector.load %arg2[%c0_3, %c0_4] : memref<16x192xbf16, #tpu.memory_space<vmem>>, vector<16x192xbf16>
    %cst = arith.constant dense<0.000000e+00> : vector<256x192xf32>
    %4 = tpu.matmul %1, %3, %cst {dimension_numbers = #tpu.dot_dimension_numbers<[1], [0], [0], [1], [0, 0, 1, 1], [], []>} : vector<256x16xbf16>, vector<16x192xbf16>, vector<256x192xf32> -> vector<256x192xf32>
    %5 = vector.extract_strided_slice %4 {offsets = [0, 0], sizes = [256, 16], strides = [1, 1]} : vector<256x192xf32> to vector<256x16xf32>
    %6 = vector.extract_strided_slice %2 {offsets = [0, 0], sizes = [1, 16], strides = [1, 1]} : vector<8x128xf32> to vector<1x16xf32>
    %7 = vector.broadcast %6 : vector<1x16xf32> to vector<256x16xf32>
    %8 = arith.addf %5, %7 : vector<256x16xf32>
    %cst_5 = arith.constant 0.000000e+00 : f32
    %9 = vector.broadcast %cst_5 : f32 to vector<256x16xf32>
    %10 = arith.maximumf %8, %9 : vector<256x16xf32>
    %11 = vector.extract_strided_slice %4 {offsets = [0, 128], sizes = [256, 64], strides = [1, 1]} : vector<256x192xf32> to vector<256x64xf32>
    %12 = arith.truncf %10 : vector<256x16xf32> to vector<256x16xbf16>
    %c0_6 = arith.constant 0 : index
    %c0_7 = arith.constant 0 : index
    %13 = vector.load %arg3[%c0_6, %c0_7] : memref<16x16xbf16, #tpu.memory_space<vmem>>, vector<16x16xbf16>
    %cst_8 = arith.constant dense<0.000000e+00> : vector<256x16xf32>
    %14 = tpu.matmul %12, %13, %cst_8 {dimension_numbers = #tpu.dot_dimension_numbers<[1], [0], [0], [1], [0, 0, 1, 1], [], []>} : vector<256x16xbf16>, vector<16x16xbf16>, vector<256x16xf32> -> vector<256x16xf32>
    %15 = vector.extract_strided_slice %2 {offsets = [1, 0], sizes = [1, 16], strides = [1, 1]} : vector<8x128xf32> to vector<1x16xf32>
    %16 = vector.broadcast %15 : vector<1x16xf32> to vector<256x16xf32>
    %17 = arith.addf %14, %16 : vector<256x16xf32>
    %cst_9 = arith.constant 0.000000e+00 : f32
    %18 = vector.broadcast %cst_9 : f32 to vector<256x16xf32>
    %19 = arith.maximumf %17, %18 : vector<256x16xf32>
    %20 = arith.truncf %19 : vector<256x16xf32> to vector<256x16xbf16>
    %c0_10 = arith.constant 0 : index
    %c0_11 = arith.constant 0 : index
    %21 = vector.load %arg4[%c0_10, %c0_11] : memref<16x64xbf16, #tpu.memory_space<vmem>>, vector<16x64xbf16>
    %cst_12 = arith.constant dense<0.000000e+00> : vector<256x64xf32>
    %22 = tpu.matmul %20, %21, %cst_12 {dimension_numbers = #tpu.dot_dimension_numbers<[1], [0], [0], [1], [0, 0, 1, 1], [], []>} : vector<256x16xbf16>, vector<16x64xbf16>, vector<256x64xf32> -> vector<256x64xf32>
    %23 = arith.addf %11, %22 : vector<256x64xf32>
    %24 = vector.extract_strided_slice %2 {offsets = [2, 0], sizes = [1, 64], strides = [1, 1]} : vector<8x128xf32> to vector<1x64xf32>
    %25 = vector.broadcast %24 : vector<1x64xf32> to vector<256x64xf32>
    %26 = arith.addf %23, %25 : vector<256x64xf32>
    %cst_13 = arith.constant 0.000000e+00 : f32
    %27 = vector.broadcast %cst_13 : f32 to vector<256x64xf32>
    %28 = arith.maximumf %26, %27 : vector<256x64xf32>
    %29 = arith.truncf %28 : vector<256x64xf32> to vector<256x64xbf16>
    %c0_14 = arith.constant 0 : index
    %c0_15 = arith.constant 0 : index
    %30 = vector.load %arg5[%c0_14, %c0_15] : memref<64x64xbf16, #tpu.memory_space<vmem>>, vector<64x64xbf16>
    %cst_16 = arith.constant dense<0.000000e+00> : vector<256x64xf32>
    %31 = tpu.matmul %29, %30, %cst_16 {dimension_numbers = #tpu.dot_dimension_numbers<[1], [0], [0], [1], [0, 0, 1, 1], [], []>} : vector<256x64xbf16>, vector<64x64xbf16>, vector<256x64xf32> -> vector<256x64xf32>
    %32 = vector.extract_strided_slice %2 {offsets = [3, 0], sizes = [1, 64], strides = [1, 1]} : vector<8x128xf32> to vector<1x64xf32>
    %33 = vector.broadcast %32 : vector<1x64xf32> to vector<256x64xf32>
    %34 = arith.addf %31, %33 : vector<256x64xf32>
    %cst_17 = arith.constant 0.000000e+00 : f32
    %35 = vector.broadcast %cst_17 : f32 to vector<256x64xf32>
    %36 = arith.maximumf %34, %35 : vector<256x64xf32>
    %37 = arith.truncf %36 : vector<256x64xf32> to vector<256x64xbf16>
    %c0_18 = arith.constant 0 : index
    %c0_19 = arith.constant 0 : index
    %38 = vector.load %arg6[%c0_18, %c0_19] : memref<64x8xbf16, #tpu.memory_space<vmem>>, vector<64x8xbf16>
    %cst_20 = arith.constant dense<0.000000e+00> : vector<256x8xf32>
    %39 = tpu.matmul %37, %38, %cst_20 {dimension_numbers = #tpu.dot_dimension_numbers<[1], [0], [0], [1], [0, 0, 1, 1], [], []>} : vector<256x64xbf16>, vector<64x8xbf16>, vector<256x8xf32> -> vector<256x8xf32>
    %40 = vector.extract_strided_slice %2 {offsets = [4, 0], sizes = [1, 8], strides = [1, 1]} : vector<8x128xf32> to vector<1x8xf32>
    %41 = vector.broadcast %40 : vector<1x8xf32> to vector<256x8xf32>
    %42 = arith.addf %39, %41 : vector<256x8xf32>
    %c0_21 = arith.constant 0 : index
    %c0_22 = arith.constant 0 : index
    %43 = vector.load %arg8[%c0_21, %c0_22] : memref<256x8xf32, #tpu.memory_space<vmem>>, vector<256x8xf32>
    tpu.vector_store %arg8[%c0_21, %c0_22], %42 {strides = array<i32>} : memref<256x8xf32, #tpu.memory_space<vmem>>, vector<256x8xf32>,
    return
  }
  func.func @transform_0(%arg0: i32) -> (i32, i32) {
    %c0_i32 = arith.constant 0 : i32
    %c0_i32_0 = arith.constant 0 : i32
    return %arg0, %c0_i32 : i32, i32
  }
  func.func @transform_1(%arg0: i32) -> (i32, i32) {
    %c0_i32 = arith.constant 0 : i32
    %c0_i32_0 = arith.constant 0 : i32
    %c0_i32_1 = arith.constant 0 : i32
    return %c0_i32, %c0_i32_0 : i32, i32
  }
  func.func @transform_2(%arg0: i32) -> (i32, i32) {
    %c0_i32 = arith.constant 0 : i32
    %c0_i32_0 = arith.constant 0 : i32
    %c0_i32_1 = arith.constant 0 : i32
    return %c0_i32, %c0_i32_0 : i32, i32
  }
  func.func @transform_3(%arg0: i32) -> (i32, i32) {
    %c0_i32 = arith.constant 0 : i32
    %c0_i32_0 = arith.constant 0 : i32
    %c0_i32_1 = arith.constant 0 : i32
    return %c0_i32, %c0_i32_0 : i32, i32
  }
  func.func @transform_4(%arg0: i32) -> (i32, i32) {
    %c0_i32 = arith.constant 0 : i32
    %c0_i32_0 = arith.constant 0 : i32
    %c0_i32_1 = arith.constant 0 : i32
    return %c0_i32, %c0_i32_0 : i32, i32
  }
  func.func @transform_5(%arg0: i32) -> (i32, i32) {
    %c0_i32 = arith.constant 0 : i32
    %c0_i32_0 = arith.constant 0 : i32
    %c0_i32_1 = arith.constant 0 : i32
    return %c0_i32, %c0_i32_0 : i32, i32
  }
  func.func @transform_6(%arg0: i32) -> (i32, i32) {
    %c0_i32 = arith.constant 0 : i32
    %c0_i32_0 = arith.constant 0 : i32
    %c0_i32_1 = arith.constant 0 : i32
    return %c0_i32, %c0_i32_0 : i32, i32
  }
  func.func @transform_7(%arg0: i32) -> (i32, i32) {
    %c0_i32 = arith.constant 0 : i32
    %c0_i32_0 = arith.constant 0 : i32
    return %arg0, %c0_i32 : i32, i32
  }
}

</mosaic_0001>

<bundles_post_ra>
// kernel: tpu_custom_call.1
= control target key start
LH: loop header
LB: loop body
LE: loop exit
PB: predicated region body
PF: predicated region fallthrough
CT: control target
= control target key end

     0   :  { %s2297_s24 = smov 0   ;;  %s2835_s0 = inlined_call_operand.vmem [shape: f32[512,16], index: 0, kind: input, shape index: {}]   ;;  %s2836_s1 = inlined_call_operand.vmem [shape: bf16[16,192], index: 1, kind: input, shape index: {}]   ;;  %s2837_s2 = inlined_call_operand.vmem [shape: bf16[16,16], index: 2, kind: input, shape index: {}]   ;;  %s2838_s3 = inlined_call_operand.vmem [shape: bf16[16,64], index: 3, kind: input, shape index: {}]   ;;  %s2839_s4 = inlined_call_operand.vmem [shape: bf16[64,64], index: 4, kind: input, shape index: {}]   ;;  %s2840_s5 = inlined_call_operand.vmem [shape: bf16[64,8], index: 5, kind: input, shape index: {}]   ;;  %s2841_s6 = inlined_call_operand.vmem [shape: f32[8,128], index: 6, kind: input, shape index: {}]   ;;  %s2842_s7 = inlined_call_operand.vmem [shape: f32[512,8], index: 7, kind: output, shape index: {}]  }
   0x1 LB: > { %s1900_s25 = sadd.s32 4294967295, %s2254_s24   ;;  %p1904_p0 = scmp.ge.s32.totalorder %s2254_s24, 1  ;;  %s2254_s24 = sphi %s2297_s24, %s17_s24  }
   0x2   : > { %p238_p1 = scmp.lt.s32.totalorder %s2254_s24, 3 }
   0x4   : > { %p239_p2 = pnand %p1904_p0, %p238_p1 }
   0x5   : > { %s1905_s28 = sshll.u32 (!%p239_p2), %s1900_s25, 5 }
   0x6   : > { %242 = sbr.rel (%p239_p2) target bundleno = 1162 (0x48a), region = 48  ;;  %p271_p3 = scmp.lt.s32.totalorder (!%p239_p2), %s1905_s28, 63 }
   0xb   : > { %v2234_v0 = vld [vmem:[%s2836_s1 + $0x4] ss:$8 sps:$4 sm:$0xff]   ;;  %v2236_v1 = vld [vmem:[%s2836_s1] ss:$8 sps:$4 sm:$0xff]   ;;  %v2256_v2 = vmov 0   ;;  %s2844_s28 = smov (!%p271_p3, %s1905_s28), 63  ;;  %v586_v52 = vlaneseq }
   0xc   : > { %425 = vmatprep.mubr.bf16.mxu0 %v2256_v2  ;;  %407 = vmatprep.subr.bf16.mxu0 %v2234_v0  ;;  %s1906_s8 = sshll.u32 %s2844_s28, 3  ;;  %vm344_vm0 = vcmask 130048   ;;  %v2237_v36 = vld [vmem:[%s2837_s2] sm:$0xff]   ;;  %vm1308_vm1 = vcmask 523264   ;;  %vm1811_vm2 = vcmask 64512  }
   0xd   : > { %408 = vmatpush1.bf16.msra.mxu0 %v2236_v1  ;;  %s2320_s11 = scalar_lea.vmem %s2835_s0, %s1906_s8  ;;  %2077 = vmatprep.subr.bf16.mxu1 %v2237_v36  ;;  %v2388_v53 = vshrl.u32 %v586_v52, 7  ;;  %v2394_v55 = vld [vmem:[%s2841_s6] sm:$0xff]  ;;  %s2734_s18 = scalar_lea.vmem %s2842_s7, %s1906_s8 }
   0xe   : > { %v283_v3 = vld [vmem:[%s2320_s11] sm:$0xff]  ;;  %v284_v4 = vld [vmem:[%s2320_s11 + $0x8] sm:$0xff]  ;;  %v285_v6 = vld [vmem:[%s2320_s11 + $0x10] sm:$0xff]  ;;  %2078 = vmatpush3.bf16.msra.mxu1 %v2237_v36 }
   0xf   : > { %v315_v5 = vpack.c.bf16 %v284_v4, %v283_v3  ;;  %v286_v7 = vld [vmem:[%s2320_s11 + $0x18] sm:$0xff]  ;;  %v287_v9 = vld [vmem:[%s2320_s11 + $0x20] sm:$0xff]  ;;  %v288_v10 = vld [vmem:[%s2320_s11 + $0x28] sm:$0xff]  ;;  %v588_v54 = vsub.s32 0, %v2388_v53 }
  0x10   : > { %v316_v8 = vpack.c.bf16 %v286_v7, %v285_v6  ;;  %v317_v11 = vpack.c.bf16 %v288_v10, %v287_v9  ;;  %v289_v12 = vld [vmem:[%s2320_s11 + $0x30] sm:$0xff]  ;;  %v290_v13 = vld [vmem:[%s2320_s11 + $0x38] sm:$0xff]  ;;  %v291_v15 = vld [vmem:[%s2320_s11 + $0x40] sm:$0xff] }
  0x11   : > { %1911 = vmatmul.mubr.msk.bf16.vlgmr.msra.gmra.mxu0 %vm344_vm0, %v315_v5  ;;  %v318_v14 = vpack.c.bf16 %v290_v13, %v289_v12  ;;  %v292_v16 = vld [vmem:[%s2320_s11 + $0x48] sm:$0xff]  ;;  %v293_v18 = vld [vmem:[%s2320_s11 + $0x50] sm:$0xff]  ;;  %v294_v19 = vld [vmem:[%s2320_s11 + $0x58] sm:$0xff]  ;;  %v2397_v56 = vrot.slane %v2394_v55, %v588_v54 }
  0x12   : > { %435 = vmatprep.mubr.bf16.mxu0 %v2256_v2  ;;  %v319_v17 = vpack.c.bf16 %v292_v16, %v291_v15  ;;  %v320_v20 = vpack.c.bf16 %v294_v19, %v293_v18  ;;  %v295_v21 = vld [vmem:[%s2320_s11 + $0x60] sm:$0xff]  ;;  %v296_v22 = vld [vmem:[%s2320_s11 + $0x68] sm:$0xff]  ;;  %v297_v24 = vld [vmem:[%s2320_s11 + $0x70] sm:$0xff] }
  0x13   : > { %v321_v23 = vpack.c.bf16 %v296_v22, %v295_v21  ;;  %v298_v25 = vld [vmem:[%s2320_s11 + $0x78] sm:$0xff]  ;;  %v299_v27 = vld [vmem:[%s2320_s11 + $0x80] sm:$0xff]  ;;  %v300_v28 = vld [vmem:[%s2320_s11 + $0x88] sm:$0xff] }
  0x14   : > { %v322_v26 = vpack.c.bf16 %v298_v25, %v297_v24  ;;  %v323_v29 = vpack.c.bf16 %v300_v28, %v299_v27  ;;  %v301_v30 = vld [vmem:[%s2320_s11 + $0x90] sm:$0xff]  ;;  %v302_v31 = vld [vmem:[%s2320_s11 + $0x98] sm:$0xff]  ;;  %v303_v33 = vld [vmem:[%s2320_s11 + $0xa0] sm:$0xff] }
  0x15   : > { %v324_v32 = vpack.c.bf16 %v302_v31, %v301_v30  ;;  %v304_v34 = vld [vmem:[%s2320_s11 + $0xa8] sm:$0xff]  ;;  %v305_v37 = vld [vmem:[%s2320_s11 + $0xb0] sm:$0xff]  ;;  %v306_v38 = vld [vmem:[%s2320_s11 + $0xb8] sm:$0xff] }
  0x16   : > { %v325_v35 = vpack.c.bf16 %v304_v34, %v303_v33  ;;  %v326_v39 = vpack.c.bf16 %v306_v38, %v305_v37  ;;  %v307_v40 = vld [vmem:[%s2320_s11 + $0xc0] sm:$0xff]  ;;  %v308_v41 = vld [vmem:[%s2320_s11 + $0xc8] sm:$0xff]  ;;  %v309_v43 = vld [vmem:[%s2320_s11 + $0xd0] sm:$0xff] }
  0x17   : > { %v327_v42 = vpack.c.bf16 %v308_v41, %v307_v40  ;;  %v310_v44 = vld [vmem:[%s2320_s11 + $0xd8] sm:$0xff]  ;;  %v311_v46 = vld [vmem:[%s2320_s11 + $0xe0] sm:$0xff]  ;;  %v312_v47 = vld [vmem:[%s2320_s11 + $0xe8] sm:$0xff] }
  0x18   : > { %v328_v45 = vpack.c.bf16 %v310_v44, %v309_v43  ;;  %v329_v48 = vpack.c.bf16 %v312_v47, %v311_v46  ;;  %v313_v49 = vld [vmem:[%s2320_s11 + $0xf0] sm:$0xff]  ;;  %v314_v50 = vld [vmem:[%s2320_s11 + $0xf8] sm:$0xff] }
  0x19   : > { %1912 = vmatmul.mubr.msk.bf16.gmra.mxu0 %vm344_vm0, %v316_v8  ;;  %v330_v51 = vpack.c.bf16 %v314_v50, %v313_v49 }
  0x1a   : > { %445 = vmatprep.mubr.bf16.mxu0 %v2256_v2 }
  0x21   : > { %1913 = vmatmul.mubr.msk.bf16.gmra.mxu0 %vm344_vm0, %v317_v11 }
  0x22   : > { %455 = vmatprep.mubr.bf16.mxu0 %v2256_v2 }
  0x29   : > { %1914 = vmatmul.mubr.msk.bf16.gmra.mxu0 %vm344_vm0, %v318_v14 }
  0x2a   : > { %465 = vmatprep.mubr.bf16.mxu0 %v2256_v2 }
  0x31   : > { %1915 = vmatmul.mubr.msk.bf16.gmra.mxu0 %vm344_vm0, %v319_v17 }
  0x32   : > { %475 = vmatprep.mubr.bf16.mxu0 %v2256_v2 }
  0x39   : > { %1916 = vmatmul.mubr.msk.bf16.gmra.mxu0 %vm344_vm0, %v320_v20 }
  0x3a   : > { %485 = vmatprep.mubr.bf16.mxu0 %v2256_v2 }
  0x41   : > { %1917 = vmatmul.mubr.msk.bf16.gmra.mxu0 %vm344_vm0, %v321_v23 }
  0x42   : > { %495 = vmatprep.mubr.bf16.mxu0 %v2256_v2 }
  0x49   : > { %1918 = vmatmul.mubr.msk.bf16.gmra.mxu0 %vm344_vm0, %v322_v26 }
  0x4a   : > { %505 = vmatprep.mubr.bf16.mxu0 %v2256_v2 }
  0x51   : > { %1919 = vmatmul.mubr.msk.bf16.gmra.mxu0 %vm344_vm0, %v323_v29 }
  0x52   : > { %515 = vmatprep.mubr.bf16.mxu0 %v2256_v2 }
  0x59   : > { %1920 = vmatmul.mubr.msk.bf16.gmra.mxu0 %vm344_vm0, %v324_v32 }
  0x5a   : > { %525 = vmatprep.mubr.bf16.mxu0 %v2256_v2 }
  0x61   : > { %1921 = vmatmul.mubr.msk.bf16.gmra.mxu0 %vm344_vm0, %v325_v35 }
  0x62   : > { %535 = vmatprep.mubr.bf16.mxu0 %v2256_v2 }
  0x69   : > { %1922 = vmatmul.mubr.msk.bf16.gmra.mxu0 %vm344_vm0, %v326_v39 }
  0x6a   : > { %545 = vmatprep.mubr.bf16.mxu0 %v2256_v2 }
  0x71   : > { %1923 = vmatmul.mubr.msk.bf16.gmra.mxu0 %vm344_vm0, %v327_v42 }
  0x72   : > { %555 = vmatprep.mubr.bf16.mxu0 %v2256_v2 }
  0x79   : > { %1924 = vmatmul.mubr.msk.bf16.gmra.mxu0 %vm344_vm0, %v328_v45 }
  0x7a   : > { %565 = vmatprep.mubr.bf16.mxu0 %v2256_v2 }
  0x81   : > { %1925 = vmatmul.mubr.msk.bf16.gmra.mxu0 %vm344_vm0, %v329_v48 }
  0x82   : > { %575 = vmatprep.mubr.bf16.mxu0 %v2256_v2 }
  0x89   : > { %1926 = vmatmul.mubr.msk.bf16.gmra.mxu0 %vm344_vm0, %v330_v51 }
  0xd1   : > { %v427_v57 = vpop.f32.mrf.mxu0 }
  0xd2   : > { %v590_v59 = vadd.f32 %v2397_v56, %v427_v57 }
  0xd3   : > { %v2399_v58 = vpop.f32.mrf.mxu0 }
  0xd4   : > { %v622_v63 = vmax.f32 %v590_v59, 0.0 }
  0xd5   : > { %v431_v60 = vpop.f32.mrf.mxu0 }
  0xd6   : > { %v591_v61 = vadd.f32 %v2397_v56, %v431_v60 }
  0xd7   : > { %v2403_v62 = vpop.f32.mrf.mxu0 }
  0xd8   : > { %v623_v0 = vmax.f32 %v591_v61, 0.0 }
  0xd9   : > { %v437_v1 = vpop.f32.mrf.mxu0 }
  0xda   : > { %v654_v2 = vpack.c.bf16 %v623_v0, %v622_v63  ;;  %v592_v4 = vadd.f32 %v2397_v56, %v437_v1 }
  0xdb   : > { %v2405_v3 = vpop.f32.mrf.mxu0 }
  0xdc   : > { %2079 = vmatprep.mubr.msk.bf16.mxu1 %vm344_vm0, %v654_v2  ;;  %v624_v8 = vmax.f32 %v592_v4, 0.0 }
  0xdd   : > { %v441_v5 = vpop.f32.mrf.mxu0 }
  0xde   : > { %v593_v6 = vadd.f32 %v2397_v56, %v441_v5 }
  0xdf   : > { %v2410_v7 = vpop.f32.mrf.mxu0 }
  0xe0   : > { %v625_v9 = vmax.f32 %v593_v6, 0.0 }
  0xe1   : > { %v447_v10 = vpop.f32.mrf.mxu0 }
  0xe2   : > { %v655_v11 = vpack.c.bf16 %v625_v9, %v624_v8  ;;  %v594_v13 = vadd.f32 %v2397_v56, %v447_v10 }
  0xe3   : > { %v2412_v12 = vpop.f32.mrf.mxu0 }
  0xe4   : > { %2080 = vmatmul.mubr.msk.bf16.vlgmr.msra.gmra.mxu1 %vm344_vm0, %v655_v11  ;;  %v626_v17 = vmax.f32 %v594_v13, 0.0 }
  0xe5   : > { %v451_v14 = vpop.f32.mrf.mxu0 }
  0xe6   : > { %v595_v15 = vadd.f32 %v2397_v56, %v451_v14 }
  0xe7   : > { %v2417_v16 = vpop.f32.mrf.mxu0 }
  0xe8   : > { %v627_v18 = vmax.f32 %v595_v15, 0.0 }
  0xe9   : > { %v457_v19 = vpop.f32.mrf.mxu0 }
  0xea   : > { %v656_v20 = vpack.c.bf16 %v627_v18, %v626_v17  ;;  %v596_v22 = vadd.f32 %v2397_v56, %v457_v19 }
  0xeb   : > { %v2419_v21 = vpop.f32.mrf.mxu0 }
  0xec   : > { %2083 = vmatprep.mubr.msk.bf16.mxu1 %vm344_vm0, %v656_v20  ;;  %v628_v26 = vmax.f32 %v596_v22, 0.0 }
  0xed   : > { %v461_v23 = vpop.f32.mrf.mxu0 }
  0xee   : > { %v597_v24 = vadd.f32 %v2397_v56, %v461_v23 }
  0xef   : > { %v2424_v25 = vpop.f32.mrf.mxu0 }
  0xf0   : > { %v629_v27 = vmax.f32 %v597_v24, 0.0 }
  0xf1   : > { %v467_v28 = vpop.f32.mrf.mxu0 }
  0xf2   : > { %v657_v29 = vpack.c.bf16 %v629_v27, %v628_v26  ;;  %v598_v31 = vadd.f32 %v2397_v56, %v467_v28 }
  0xf3   : > { %v2426_v30 = vpop.f32.mrf.mxu0 }
  0xf4   : > { %2084 = vmatmul.mubr.msk.bf16.gmra.mxu1 %vm344_vm0, %v657_v29  ;;  %v630_v35 = vmax.f32 %v598_v31, 0.0 }
  0xf5   : > { %v471_v32 = vpop.f32.mrf.mxu0 }
  0xf6   : > { %v599_v33 = vadd.f32 %v2397_v56, %v471_v32 }
  0xf7   : > { %v2431_v34 = vpop.f32.mrf.mxu0 }
  0xf8   : > { %v631_v36 = vmax.f32 %v599_v33, 0.0 }
  0xf9   : > { %v477_v37 = vpop.f32.mrf.mxu0 }
  0xfa   : > { %v658_v38 = vpack.c.bf16 %v631_v36, %v630_v35  ;;  %v600_v40 = vadd.f32 %v2397_v56, %v477_v37 }
  0xfb   : > { %v2433_v39 = vpop.f32.mrf.mxu0 }
  0xfc   : > { %2087 = vmatprep.mubr.msk.bf16.mxu1 %vm344_vm0, %v658_v38  ;;  %v632_v44 = vmax.f32 %v600_v40, 0.0 }
  0xfd   : > { %v481_v41 = vpop.f32.mrf.mxu0 }
  0xfe   : > { %v601_v42 = vadd.f32 %v2397_v56, %v481_v41 }
  0xff   : > { %v2438_v43 = vpop.f32.mrf.mxu0 }
 0x100   : > { %v633_v45 = vmax.f32 %v601_v42, 0.0 }
 0x101   : > { %v487_v46 = vpop.f32.mrf.mxu0 }
 0x102   : > { %v659_v47 = vpack.c.bf16 %v633_v45, %v632_v44  ;;  %v602_v49 = vadd.f32 %v2397_v56, %v487_v46  ;;  %v2238_v46 = vld [vmem:[%s2838_s3] sm:$0xff]  }
 0x103   : > { %v2440_v48 = vpop.f32.mrf.mxu0  ;;  %2111 = vmatprep.subr.bf16.mxu1 %v2238_v46 }
 0x104   : > { %2088 = vmatmul.mubr.msk.bf16.gmra.mxu1 %vm344_vm0, %v659_v47  ;;  %v634_v54 = vmax.f32 %v602_v49, 0.0 }
 0x105   : > { %v491_v50 = vpop.f32.mrf.mxu0  ;;  %2112 = vmatpush3.bf16.msra.mxu1 %v2238_v46 }
 0x106   : > { %v603_v51 = vadd.f32 %v2397_v56, %v491_v50 }
 0x107   : > { %v2445_v52 = vpop.f32.mrf.mxu0 }
 0x108   : > { %v635_v57 = vmax.f32 %v603_v51, 0.0 }
 0x109   : > { %v497_v59 = vpop.f32.mrf.mxu0 }
 0x10a   : > { %v660_v60 = vpack.c.bf16 %v635_v57, %v634_v54  ;;  %v604_v63 = vadd.f32 %v2397_v56, %v497_v59 }
 0x10b   : > { %v2447_v61 = vpop.f32.mrf.mxu0 }
 0x10c   : > { %2091 = vmatprep.mubr.msk.bf16.mxu1 %vm344_vm0, %v660_v60  ;;  %v636_v4 = vmax.f32 %v604_v63, 0.0 }
 0x10d   : > { %v501_v0 = vpop.f32.mrf.mxu0 }
 0x10e   : > { %v605_v1 = vadd.f32 %v2397_v56, %v501_v0 }
 0x10f   : > { %v2452_v2 = vpop.f32.mrf.mxu0 }
 0x110   : > { %v637_v5 = vmax.f32 %v605_v1, 0.0 }
 0x111   : > { %v507_v6 = vpop.f32.mrf.mxu0 }
 0x112   : > { %v661_v8 = vpack.c.bf16 %v637_v5, %v636_v4  ;;  %v606_v10 = vadd.f32 %v2397_v56, %v507_v6 }
 0x113   : > { %v2454_v9 = vpop.f32.mrf.mxu0 }
 0x114   : > { %2092 = vmatmul.mubr.msk.bf16.gmra.mxu1 %vm344_vm0, %v661_v8  ;;  %v638_v15 = vmax.f32 %v606_v10, 0.0 }
 0x115   : > { %v511_v11 = vpop.f32.mrf.mxu0 }
 0x116   : > { %v607_v13 = vadd.f32 %v2397_v56, %v511_v11 }
 0x117   : > { %v2459_v14 = vpop.f32.mrf.mxu0 }
 0x118   : > { %v639_v17 = vmax.f32 %v607_v13, 0.0 }
 0x119   : > { %v517_v18 = vpop.f32.mrf.mxu0 }
 0x11a   : > { %v662_v19 = vpack.c.bf16 %v639_v17, %v638_v15  ;;  %v608_v22 = vadd.f32 %v2397_v56, %v517_v18 }
 0x11b   : > { %v2461_v20 = vpop.f32.mrf.mxu0 }
 0x11c   : > { %2095 = vmatprep.mubr.msk.bf16.mxu1 %vm344_vm0, %v662_v19  ;;  %v640_v27 = vmax.f32 %v608_v22, 0.0 }
 0x11d   : > { %v521_v23 = vpop.f32.mrf.mxu0 }
 0x11e   : > { %v609_v24 = vadd.f32 %v2397_v56, %v521_v23 }
 0x11f   : > { %v2466_v26 = vpop.f32.mrf.mxu0 }
 0x120   : > { %v641_v28 = vmax.f32 %v609_v24, 0.0 }
 0x121   : > { %v527_v29 = vpop.f32.mrf.mxu0 }
 0x122   : > { %v663_v31 = vpack.c.bf16 %v641_v28, %v640_v27  ;;  %v610_v33 = vadd.f32 %v2397_v56, %v527_v29 }
 0x123   : > { %v2468_v32 = vpop.f32.mrf.mxu0 }
 0x124   : > { %2096 = vmatmul.mubr.msk.bf16.gmra.mxu1 %vm344_vm0, %v663_v31  ;;  %v642_v38 = vmax.f32 %v610_v33, 0.0 }
 0x125   : > { %v531_v35 = vpop.f32.mrf.mxu0 }
 0x126   : > { %v611_v36 = vadd.f32 %v2397_v56, %v531_v35 }
 0x127   : > { %v2473_v37 = vpop.f32.mrf.mxu0 }
 0x128   : > { %v643_v40 = vmax.f32 %v611_v36, 0.0 }
 0x129   : > { %v537_v41 = vpop.f32.mrf.mxu0 }
 0x12a   : > { %v664_v42 = vpack.c.bf16 %v643_v40, %v642_v38  ;;  %v612_v45 = vadd.f32 %v2397_v56, %v537_v41 }
 0x12b   : > { %v2475_v44 = vpop.f32.mrf.mxu0 }
 0x12c   : > { %2099 = vmatprep.mubr.msk.bf16.mxu1 %vm344_vm0, %v664_v42  ;;  %v644_v51 = vmax.f32 %v612_v45, 0.0 }
 0x12d   : > { %v541_v47 = vpop.f32.mrf.mxu0 }
 0x12e   : > { %v613_v49 = vadd.f32 %v2397_v56, %v541_v47 }
 0x12f   : > { %v2483_v50 = vpop.f32.mrf.mxu0 }
 0x130   : > { %v645_v54 = vmax.f32 %v613_v49, 0.0 }
 0x131   : > { %v547_v57 = vpop.f32.mrf.mxu0 }
 0x132   : > { %v665_v59 = vpack.c.bf16 %v645_v54, %v644_v51  ;;  %v614_v63 = vadd.f32 %v2397_v56, %v547_v57  ;;  %v674_v54 = vsub.s32 1, %v2388_v53  ;;  %v2239_v57 = vld [vmem:[%s2839_s4 + $0x18] sm:$0xff]  }
 0x133   : > { %v2485_v60 = vpop.f32.mrf.mxu0  ;;  %2145 = vmatprep.subr.bf16.mxu0 %v2239_v57 }
 0x134   : > { %2100 = vmatmul.mubr.msk.bf16.gmra.mxu1 %vm344_vm0, %v665_v59  ;;  %v646_v5 = vmax.f32 %v614_v63, 0.0  ;;  %v2240_v59 = vld [vmem:[%s2839_s4 + $0x10] sm:$0xff]   ;;  %2146 = vmatpush3.bf16.msra.mxu0 %v2239_v57 }
 0x135   : > { %v551_v0 = vpop.f32.mrf.mxu0  ;;  %2147 = vmatprep.subr.bf16.mxu0 %v2240_v59 }
 0x136   : > { %v615_v1 = vadd.f32 %v2397_v56, %v551_v0 }
 0x137   : > { %v2490_v4 = vpop.f32.mrf.mxu0 }
 0x138   : > { %v647_v6 = vmax.f32 %v615_v1, 0.0  ;;  %2148 = vmatpush3.bf16.msra.mxu0 %v2240_v59 }
 0x139   : > { %v557_v8 = vpop.f32.mrf.mxu0 }
 0x13a   : > { %v666_v10 = vpack.c.bf16 %v647_v6, %v646_v5  ;;  %v616_v13 = vadd.f32 %v2397_v56, %v557_v8 }
 0x13b   : > { %v2492_v11 = vpop.f32.mrf.mxu0 }
 0x13c   : > { %2103 = vmatprep.mubr.msk.bf16.mxu1 %vm344_vm0, %v666_v10  ;;  %v648_v19 = vmax.f32 %v616_v13, 0.0 }
 0x13d   : > { %v561_v15 = vpop.f32.mrf.mxu0 }
 0x13e   : > { %v617_v17 = vadd.f32 %v2397_v56, %v561_v15 }
 0x13f   : > { %v2497_v18 = vpop.f32.mrf.mxu0 }
 0x140   : > { %v649_v22 = vmax.f32 %v617_v17, 0.0 }
 0x141   : > { %v567_v23 = vpop.f32.mrf.mxu0 }
 0x142   : > { %v667_v24 = vpack.c.bf16 %v649_v22, %v648_v19  ;;  %v618_v28 = vadd.f32 %v2397_v56, %v567_v23 }
 0x143   : > { %v2499_v27 = vpop.f32.mrf.mxu0 }
 0x144   : > { %2104 = vmatmul.mubr.msk.bf16.gmra.mxu1 %vm344_vm0, %v667_v24  ;;  %v650_v35 = vmax.f32 %v618_v28, 0.0 }
 0x145   : > { %v571_v29 = vpop.f32.mrf.mxu0 }
 0x146   : > { %v619_v31 = vadd.f32 %v2397_v56, %v571_v29 }
 0x147   : > { %v2504_v33 = vpop.f32.mrf.mxu0 }
 0x148   : > { %v651_v36 = vmax.f32 %v619_v31, 0.0 }
 0x149   : > { %v577_v38 = vpop.f32.mrf.mxu0 }
 0x14a   : > { %v668_v40 = vpack.c.bf16 %v651_v36, %v650_v35  ;;  %v620_v42 = vadd.f32 %v2397_v56, %v577_v38 }
 0x14b   : > { %v2506_v41 = vpop.f32.mrf.mxu0 }
 0x14c   : > { %2107 = vmatprep.mubr.msk.bf16.mxu1 %vm344_vm0, %v668_v40  ;;  %v652_v47 = vmax.f32 %v620_v42, 0.0 }
 0x14d   : > { %v581_v45 = vpop.f32.mrf.mxu0 }
 0x14e   : > { %v621_v46 = vadd.f32 %v2397_v56, %v581_v45  ;;  %v2520_v56 = vrot.slane %v2394_v55, %v674_v54 }
 0x150   : > { %v653_v49 = vmax.f32 %v621_v46, 0.0 }
 0x152   : > { %v669_v51 = vpack.c.bf16 %v653_v49, %v652_v47 }
 0x154   : > { %2108 = vmatmul.mubr.msk.bf16.gmra.mxu1 %vm344_vm0, %v669_v51 }
 0x1a4   : > { %v2081_v63 = vpop.f32.mrf.mxu1 }
 0x1a5   : > { %v773_v8 = vadd.f32 %v2081_v63, %v2520_v56 }
 0x1a6   : > { %v764_v0 = vpop.f32.mrf.mxu1 }
 0x1a7   : > { %v765_v5 = vadd.f32 %v764_v0, %v2520_v56  ;;  %v893_v22 = vmax.f32 %v773_v8, 0.0 }
 0x1a8   : > { %v2082_v1 = vpop.f32.mrf.mxu1 }
 0x1a9   : > { %v776_v6 = vadd.f32 %v2082_v1, %v2520_v56  ;;  %v891_v17 = vmax.f32 %v765_v5, 0.0 }
 0x1aa   : > { %v767_v10 = vpop.f32.mrf.mxu1 }
 0x1ab   : > { %v768_v13 = vadd.f32 %v767_v10, %v2520_v56  ;;  %v894_v15 = vmax.f32 %v776_v6, 0.0 }
 0x1ad   : > { %v892_v19 = vmax.f32 %v768_v13, 0.0  ;;  %v924_v24 = vpack.c.bf16 %v894_v15, %v893_v22 }
 0x1af   : > { %v923_v23 = vpack.c.bf16 %v892_v19, %v891_v17 }
 0x1b1   : > { %2113 = vmatprep.mubr.msk.bf16.mxu1 %vm344_vm0, %v923_v23 }
 0x1b2   : > { %2114 = vmatmul.mubr.msk.bf16.vlgmr.msra.gmra.mxu1 %vm344_vm0, %v924_v24 }
 0x1b4   : > { %v2085_v28 = vpop.f32.mrf.mxu1 }
 0x1b5   : > { %v789_v38 = vadd.f32 %v2085_v28, %v2520_v56 }
 0x1b6   : > { %v780_v29 = vpop.f32.mrf.mxu1 }
 0x1b7   : > { %v781_v35 = vadd.f32 %v780_v29, %v2520_v56  ;;  %v897_v49 = vmax.f32 %v789_v38, 0.0 }
 0x1b8   : > { %v2086_v31 = vpop.f32.mrf.mxu1 }
 0x1b9   : > { %v792_v36 = vadd.f32 %v2086_v31, %v2520_v56  ;;  %v895_v46 = vmax.f32 %v781_v35, 0.0 }
 0x1ba   : > { %v783_v40 = vpop.f32.mrf.mxu1 }
 0x1bb   : > { %v784_v42 = vadd.f32 %v783_v40, %v2520_v56  ;;  %v898_v45 = vmax.f32 %v792_v36, 0.0 }
 0x1bd   : > { %v896_v47 = vmax.f32 %v784_v42, 0.0  ;;  %v926_v54 = vpack.c.bf16 %v898_v45, %v897_v49 }
 0x1bf   : > { %v925_v51 = vpack.c.bf16 %v896_v47, %v895_v46 }
 0x1c1   : > { %2117 = vmatprep.mubr.msk.bf16.mxu1 %vm344_vm0, %v925_v51 }
 0x1c2   : > { %2118 = vmatmul.mubr.msk.bf16.gmra.mxu1 %vm344_vm0, %v926_v54 }
 0x1c4   : > { %v2089_v57 = vpop.f32.mrf.mxu1 }
 0x1c5   : > { %v805_v5 = vadd.f32 %v2089_v57, %v2520_v56 }
 0x1c6   : > { %v796_v59 = vpop.f32.mrf.mxu1 }
 0x1c7   : > { %v797_v0 = vadd.f32 %v796_v59, %v2520_v56  ;;  %v901_v17 = vmax.f32 %v805_v5, 0.0 }
 0x1c8   : > { %v2090_v63 = vpop.f32.mrf.mxu1 }
 0x1c9   : > { %v808_v1 = vadd.f32 %v2090_v63, %v2520_v56  ;;  %v899_v13 = vmax.f32 %v797_v0, 0.0 }
 0x1ca   : > { %v799_v6 = vpop.f32.mrf.mxu1 }
 0x1cb   : > { %v800_v8 = vadd.f32 %v799_v6, %v2520_v56  ;;  %v902_v10 = vmax.f32 %v808_v1, 0.0 }
 0x1cd   : > { %v900_v15 = vmax.f32 %v800_v8, 0.0  ;;  %v928_v22 = vpack.c.bf16 %v902_v10, %v901_v17 }
 0x1cf   : > { %v927_v19 = vpack.c.bf16 %v900_v15, %v899_v13 }
 0x1d1   : > { %2121 = vmatprep.mubr.msk.bf16.mxu1 %vm344_vm0, %v927_v19 }
 0x1d2   : > { %2122 = vmatmul.mubr.msk.bf16.gmra.mxu1 %vm344_vm0, %v928_v22 }
 0x1d4   : > { %v2093_v23 = vpop.f32.mrf.mxu1 }
 0x1d5   : > { %v821_v35 = vadd.f32 %v2093_v23, %v2520_v56 }
 0x1d6   : > { %v812_v24 = vpop.f32.mrf.mxu1 }
 0x1d7   : > { %v813_v29 = vadd.f32 %v812_v24, %v2520_v56  ;;  %v905_v46 = vmax.f32 %v821_v35, 0.0  ;;  %v2241_v24 = vld [vmem:[%s2839_s4 + $0x8] sm:$0xff]  }
 0x1d8   : > { %v2094_v28 = vpop.f32.mrf.mxu1  ;;  %2149 = vmatprep.subr.bf16.mxu0 %v2241_v24 }
 0x1d9   : > { %v824_v31 = vadd.f32 %v2094_v28, %v2520_v56  ;;  %v903_v42 = vmax.f32 %v813_v29, 0.0  ;;  %2150 = vmatpush3.bf16.msra.mxu0 %v2241_v24 }
 0x1da   : > { %v815_v36 = vpop.f32.mrf.mxu1 }
 0x1db   : > { %v816_v38 = vadd.f32 %v815_v36, %v2520_v56  ;;  %v906_v40 = vmax.f32 %v824_v31, 0.0 }
 0x1dd   : > { %v904_v45 = vmax.f32 %v816_v38, 0.0  ;;  %v930_v49 = vpack.c.bf16 %v906_v40, %v905_v46  ;;  %v2242_v40 = vld [vmem:[%s2839_s4] sm:$0xff]  }
 0x1de   : > { %2151 = vmatprep.subr.bf16.mxu0 %v2242_v40 }
 0x1df   : > { %v929_v47 = vpack.c.bf16 %v904_v45, %v903_v42  ;;  %2152 = vmatpush3.bf16.msra.mxu0 %v2242_v40 }
 0x1e1   : > { %2125 = vmatprep.mubr.msk.bf16.mxu1 %vm344_vm0, %v929_v47 }
 0x1e2   : > { %2126 = vmatmul.mubr.msk.bf16.gmra.mxu1 %vm344_vm0, %v930_v49 }
 0x1e4   : > { %v2097_v51 = vpop.f32.mrf.mxu1 }
 0x1e5   : > { %v837_v0 = vadd.f32 %v2097_v51, %v2520_v56 }
 0x1e6   : > { %v828_v54 = vpop.f32.mrf.mxu1 }
 0x1e7   : > { %v829_v59 = vadd.f32 %v828_v54, %v2520_v56  ;;  %v909_v13 = vmax.f32 %v837_v0, 0.0 }
 0x1e8   : > { %v2098_v57 = vpop.f32.mrf.mxu1 }
 0x1e9   : > { %v840_v63 = vadd.f32 %v2098_v57, %v2520_v56  ;;  %v907_v8 = vmax.f32 %v829_v59, 0.0 }
 0x1ea   : > { %v831_v1 = vpop.f32.mrf.mxu1 }
 0x1eb   : > { %v832_v5 = vadd.f32 %v831_v1, %v2520_v56  ;;  %v910_v6 = vmax.f32 %v840_v63, 0.0 }
 0x1ed   : > { %v908_v10 = vmax.f32 %v832_v5, 0.0  ;;  %v932_v17 = vpack.c.bf16 %v910_v6, %v909_v13 }
 0x1ef   : > { %v931_v15 = vpack.c.bf16 %v908_v10, %v907_v8 }
 0x1f1   : > { %2129 = vmatprep.mubr.msk.bf16.mxu1 %vm344_vm0, %v931_v15 }
 0x1f2   : > { %2130 = vmatmul.mubr.msk.bf16.gmra.mxu1 %vm344_vm0, %v932_v17 }
 0x1f4   : > { %v2101_v19 = vpop.f32.mrf.mxu1 }
 0x1f5   : > { %v853_v31 = vadd.f32 %v2101_v19, %v2520_v56 }
 0x1f6   : > { %v844_v22 = vpop.f32.mrf.mxu1 }
 0x1f7   : > { %v845_v28 = vadd.f32 %v844_v22, %v2520_v56  ;;  %v913_v46 = vmax.f32 %v853_v31, 0.0 }
 0x1f8   : > { %v2102_v23 = vpop.f32.mrf.mxu1 }
 0x1f9   : > { %v856_v29 = vadd.f32 %v2102_v23, %v2520_v56  ;;  %v911_v42 = vmax.f32 %v845_v28, 0.0 }
 0x1fa   : > { %v847_v35 = vpop.f32.mrf.mxu1 }
 0x1fb   : > { %v848_v36 = vadd.f32 %v847_v35, %v2520_v56  ;;  %v914_v38 = vmax.f32 %v856_v29, 0.0 }
 0x1fd   : > { %v912_v45 = vmax.f32 %v848_v36, 0.0  ;;  %v934_v49 = vpack.c.bf16 %v914_v38, %v913_v46 }
 0x1ff   : > { %v933_v47 = vpack.c.bf16 %v912_v45, %v911_v42 }
 0x201   : > { %2133 = vmatprep.mubr.msk.bf16.mxu1 %vm344_vm0, %v933_v47 }
 0x202   : > { %2134 = vmatmul.mubr.msk.bf16.gmra.mxu1 %vm344_vm0, %v934_v49  ;;  %v1190_v49 = vsub.s32 2, %v2388_v53 }
 0x204   : > { %v2105_v51 = vpop.f32.mrf.mxu1 }
 0x205   : > { %v869_v0 = vadd.f32 %v2105_v51, %v2520_v56  ;;  %v2243_v51 = vld [vmem:[%s2840_s5 + $0x18] sm:$0xff]  }
 0x206   : > { %v860_v54 = vpop.f32.mrf.mxu1  ;;  %2185 = vmatprep.subr.bf16.mxu1 %v2243_v51 }
 0x207   : > { %v861_v59 = vadd.f32 %v860_v54, %v2520_v56  ;;  %v917_v13 = vmax.f32 %v869_v0, 0.0  ;;  %2186 = vmatpush3.bf16.msra.mxu1 %v2243_v51 }
 0x208   : > { %v2106_v57 = vpop.f32.mrf.mxu1 }
 0x209   : > { %v872_v63 = vadd.f32 %v2106_v57, %v2520_v56  ;;  %v915_v8 = vmax.f32 %v861_v59, 0.0  ;;  %v2583_v59 = vrot.slane %v2394_v55, %v1190_v49 }
 0x20a   : > { %v863_v1 = vpop.f32.mrf.mxu1 }
 0x20b   : > { %v864_v5 = vadd.f32 %v863_v1, %v2520_v56  ;;  %v918_v6 = vmax.f32 %v872_v63, 0.0 }
 0x20d   : > { %v916_v10 = vmax.f32 %v864_v5, 0.0  ;;  %v936_v17 = vpack.c.bf16 %v918_v6, %v917_v13 }
 0x20f   : > { %v935_v15 = vpack.c.bf16 %v916_v10, %v915_v8 }
 0x211   : > { %2137 = vmatprep.mubr.msk.bf16.mxu1 %vm344_vm0, %v935_v15 }
 0x212   : > { %2138 = vmatmul.mubr.msk.bf16.gmra.mxu1 %vm344_vm0, %v936_v17 }
 0x214   : > { %v2109_v19 = vpop.f32.mrf.mxu1 }
 0x215   : > { %v885_v29 = vadd.f32 %v2109_v19, %v2520_v56 }
 0x216   : > { %v876_v22 = vpop.f32.mrf.mxu1 }
 0x217   : > { %v877_v24 = vadd.f32 %v876_v22, %v2520_v56  ;;  %v921_v42 = vmax.f32 %v885_v29, 0.0 }
 0x218   : > { %v2110_v23 = vpop.f32.mrf.mxu1 }
 0x219   : > { %v888_v28 = vadd.f32 %v2110_v23, %v2520_v56  ;;  %v919_v38 = vmax.f32 %v877_v24, 0.0 }
 0x21a   : > { %v879_v31 = vpop.f32.mrf.mxu1 }
 0x21b   : > { %v880_v35 = vadd.f32 %v879_v31, %v2520_v56  ;;  %v922_v36 = vmax.f32 %v888_v28, 0.0 }
 0x21d   : > { %v920_v40 = vmax.f32 %v880_v35, 0.0  ;;  %v938_v46 = vpack.c.bf16 %v922_v36, %v921_v42 }
 0x21f   : > { %v937_v45 = vpack.c.bf16 %v920_v40, %v919_v38 }
 0x221   : > { %2141 = vmatprep.mubr.msk.bf16.mxu1 %vm344_vm0, %v937_v45 }
 0x222   : > { %2142 = vmatmul.mubr.msk.bf16.gmra.mxu1 %vm344_vm0, %v938_v46 }
 0x272   : > { %v2115_v47 = vpop.f32.mrf.mxu1 }
 0x273   : > { %v1158_v57 = vadd.f32 %v2115_v47, %v2405_v3 }
 0x274   : > { %v1029_v54 = vpop.f32.mrf.mxu1 }
 0x275   : > { %v1156_v56 = vadd.f32 %v1029_v54, %v2399_v58  ;;  %v1194_v10 = vadd.f32 %v2583_v59, %v1158_v57 }
 0x276   : > { %v2116_v63 = vpop.f32.mrf.mxu1 }
 0x277   : > { %v1159_v0 = vadd.f32 %v2116_v63, %v2410_v7  ;;  %v1192_v5 = vadd.f32 %v2583_v59, %v1156_v56  ;;  %v1226_v17 = vmax.f32 %v1194_v10, 0.0 }
 0x278   : > { %v1032_v1 = vpop.f32.mrf.mxu1 }
 0x279   : > { %v1195_v6 = vadd.f32 %v2583_v59, %v1159_v0  ;;  %v1157_v8 = vadd.f32 %v1032_v1, %v2403_v62  ;;  %v1224_v15 = vmax.f32 %v1192_v5, 0.0 }
 0x27b   : > { %v1193_v58 = vadd.f32 %v2583_v59, %v1157_v8  ;;  %v1227_v13 = vmax.f32 %v1195_v6, 0.0 }
 0x27d   : > { %v1225_v3 = vmax.f32 %v1193_v58, 0.0  ;;  %v1257_v22 = vpack.c.bf16 %v1227_v13, %v1226_v17 }
 0x27f   : > { %v1256_v19 = vpack.c.bf16 %v1225_v3, %v1224_v15 }
 0x281   : > { %2153 = vmatprep.mubr.msk.bf16.mxu0 %vm1308_vm1, %v1256_v19 }
 0x282   : > { %v2119_v7 = vpop.f32.mrf.mxu1  ;;  %2154 = vmatmul.mubr.msk.bf16.vlgmr.msra.gmra.mxu0 %vm1308_vm1, %v1257_v22 }
 0x283   : > { %v1162_v62 = vadd.f32 %v2119_v7, %v2419_v21 }
 0x284   : > { %v1045_v23 = vpop.f32.mrf.mxu1 }
 0x285   : > { %v1160_v24 = vadd.f32 %v1045_v23, %v2412_v12  ;;  %v1198_v40 = vadd.f32 %v2583_v59, %v1162_v62 }
 0x286   : > { %v2120_v28 = vpop.f32.mrf.mxu1 }
 0x287   : > { %v1163_v29 = vadd.f32 %v2120_v28, %v2424_v25  ;;  %v1196_v35 = vadd.f32 %v2583_v59, %v1160_v24  ;;  %v1230_v12 = vmax.f32 %v1198_v40, 0.0 }
 0x288   : > { %v1048_v31 = vpop.f32.mrf.mxu1 }
 0x289   : > { %v1199_v36 = vadd.f32 %v2583_v59, %v1163_v29  ;;  %v1161_v38 = vadd.f32 %v1048_v31, %v2417_v16  ;;  %v1228_v46 = vmax.f32 %v1196_v35, 0.0 }
 0x28b   : > { %v1197_v42 = vadd.f32 %v2583_v59, %v1161_v38  ;;  %v1231_v45 = vmax.f32 %v1199_v36, 0.0 }
 0x28d   : > { %v1229_v47 = vmax.f32 %v1197_v42, 0.0  ;;  %v1259_v21 = vpack.c.bf16 %v1231_v45, %v1230_v12 }
 0x28f   : > { %v1258_v49 = vpack.c.bf16 %v1229_v47, %v1228_v46 }
 0x291   : > { %2157 = vmatprep.mubr.msk.bf16.mxu0 %vm1308_vm1, %v1258_v49 }
 0x292   : > { %v2123_v25 = vpop.f32.mrf.mxu1  ;;  %2158 = vmatmul.mubr.msk.bf16.gmra.mxu0 %vm1308_vm1, %v1259_v21 }
 0x293   : > { %v1166_v16 = vadd.f32 %v2123_v25, %v2433_v39 }
 0x294   : > { %v1061_v51 = vpop.f32.mrf.mxu1 }
 0x295   : > { %v1164_v54 = vadd.f32 %v1061_v51, %v2426_v30  ;;  %v1202_v6 = vadd.f32 %v2583_v59, %v1166_v16 }
 0x296   : > { %v2124_v56 = vpop.f32.mrf.mxu1 }
 0x297   : > { %v1167_v57 = vadd.f32 %v2124_v56, %v2438_v43  ;;  %v1200_v0 = vadd.f32 %v2583_v59, %v1164_v54  ;;  %v1234_v30 = vmax.f32 %v1202_v6, 0.0  ;;  %v2245_v6 = vld [vmem:[%s2840_s5 + $0x8] sm:$0xff]  }
 0x298   : > { %v1064_v63 = vpop.f32.mrf.mxu1 }
 0x299   : > { %v1203_v1 = vadd.f32 %v2583_v59, %v1167_v57  ;;  %v1165_v5 = vadd.f32 %v1064_v63, %v2431_v34  ;;  %v1232_v58 = vmax.f32 %v1200_v0, 0.0  ;;  %v2244_v63 = vld [vmem:[%s2840_s5 + $0x10] sm:$0xff]  }
 0x29a   : > { %2187 = vmatprep.subr.bf16.mxu1 %v2244_v63 }
 0x29b   : > { %v1201_v8 = vadd.f32 %v2583_v59, %v1165_v5  ;;  %v1235_v10 = vmax.f32 %v1203_v1, 0.0  ;;  %2188 = vmatpush3.bf16.msra.mxu1 %v2244_v63 }
 0x29c   : > { %2189 = vmatprep.subr.bf16.mxu1 %v2245_v6 }
 0x29d   : > { %v1233_v13 = vmax.f32 %v1201_v8, 0.0  ;;  %v1261_v39 = vpack.c.bf16 %v1235_v10, %v1234_v30 }
 0x29f   : > { %v1260_v15 = vpack.c.bf16 %v1233_v13, %v1232_v58  ;;  %2190 = vmatpush3.bf16.msra.mxu1 %v2245_v6 }
 0x2a1   : > { %2161 = vmatprep.mubr.msk.bf16.mxu0 %vm1308_vm1, %v1260_v15 }
 0x2a2   : > { %v2127_v43 = vpop.f32.mrf.mxu1  ;;  %2162 = vmatmul.mubr.msk.bf16.gmra.mxu0 %vm1308_vm1, %v1261_v39 }
 0x2a3   : > { %v1170_v34 = vadd.f32 %v2127_v43, %v2447_v61 }
 0x2a4   : > { %v1077_v3 = vpop.f32.mrf.mxu1 }
 0x2a5   : > { %v1168_v17 = vadd.f32 %v1077_v3, %v2440_v48  ;;  %v1206_v28 = vadd.f32 %v2583_v59, %v1170_v34 }
 0x2a6   : > { %v2128_v19 = vpop.f32.mrf.mxu1 }
 0x2a7   : > { %v1171_v22 = vadd.f32 %v2128_v19, %v2452_v2  ;;  %v1204_v23 = vadd.f32 %v2583_v59, %v1168_v17  ;;  %v1238_v48 = vmax.f32 %v1206_v28, 0.0 }
 0x2a8   : > { %v1080_v7 = vpop.f32.mrf.mxu1 }
 0x2a9   : > { %v1207_v24 = vadd.f32 %v2583_v59, %v1171_v22  ;;  %v1169_v62 = vadd.f32 %v1080_v7, %v2445_v52  ;;  %v1236_v35 = vmax.f32 %v1204_v23, 0.0 }
 0x2ab   : > { %v1205_v29 = vadd.f32 %v2583_v59, %v1169_v62  ;;  %v1239_v31 = vmax.f32 %v1207_v24, 0.0 }
 0x2ad   : > { %v1237_v36 = vmax.f32 %v1205_v29, 0.0  ;;  %v1263_v61 = vpack.c.bf16 %v1239_v31, %v1238_v48 }
 0x2af   : > { %v1262_v38 = vpack.c.bf16 %v1237_v36, %v1236_v35 }
 0x2b1   : > { %2165 = vmatprep.mubr.msk.bf16.mxu0 %vm1308_vm1, %v1262_v38 }
 0x2b2   : > { %v2131_v2 = vpop.f32.mrf.mxu1  ;;  %2166 = vmatmul.mubr.msk.bf16.gmra.mxu0 %vm1308_vm1, %v1263_v61 }
 0x2b3   : > { %v1174_v52 = vadd.f32 %v2131_v2, %v2461_v20 }
 0x2b4   : > { %v1093_v40 = vpop.f32.mrf.mxu1 }
 0x2b5   : > { %v1172_v42 = vadd.f32 %v1093_v40, %v2454_v9  ;;  %v1210_v25 = vadd.f32 %v2583_v59, %v1174_v52  ;;  %v583_v52 = vpop.f32.mrf.mxu0 }
 0x2b6   : > { %v2132_v45 = vpop.f32.mrf.mxu1 }
 0x2b7   : > { %v1175_v46 = vadd.f32 %v2132_v45, %v2466_v26  ;;  %v1208_v12 = vadd.f32 %v2583_v59, %v1172_v42  ;;  %v1242_v9 = vmax.f32 %v1210_v25, 0.0 }
 0x2b8   : > { %v1096_v47 = vpop.f32.mrf.mxu1 }
 0x2b9   : > { %v1211_v49 = vadd.f32 %v2583_v59, %v1175_v46  ;;  %v1173_v21 = vadd.f32 %v1096_v47, %v2459_v14  ;;  %v1240_v16 = vmax.f32 %v1208_v12, 0.0 }
 0x2bb   : > { %v1209_v51 = vadd.f32 %v2583_v59, %v1173_v21  ;;  %v1243_v54 = vmax.f32 %v1211_v49, 0.0 }
 0x2bd   : > { %v1241_v56 = vmax.f32 %v1209_v51, 0.0  ;;  %v1265_v20 = vpack.c.bf16 %v1243_v54, %v1242_v9 }
 0x2bf   : > { %v1264_v57 = vpack.c.bf16 %v1241_v56, %v1240_v16 }
 0x2c1   : > { %2169 = vmatprep.mubr.msk.bf16.mxu0 %vm1308_vm1, %v1264_v57 }
 0x2c2   : > { %v2135_v26 = vpop.f32.mrf.mxu1  ;;  %2170 = vmatmul.mubr.msk.bf16.gmra.mxu0 %vm1308_vm1, %v1265_v20 }
 0x2c3   : > { %v1178_v1 = vadd.f32 %v2135_v26, %v2475_v44  ;;  %v2246_v44 = vld [vmem:[%s2840_s5] sm:$0xff]  }
 0x2c4   : > { %v1109_v14 = vpop.f32.mrf.mxu1  ;;  %2191 = vmatprep.subr.bf16.mxu1 %v2246_v44 }
 0x2c5   : > { %v1176_v0 = vadd.f32 %v1109_v14, %v2468_v32  ;;  %v1214_v32 = vadd.f32 %v2583_v59, %v1178_v1  ;;  %2192 = vmatpush3.bf16.msra.mxu1 %v2246_v44 }
 0x2c6   : > { %v2136_v5 = vpop.f32.mrf.mxu1 }
 0x2c7   : > { %v1179_v8 = vadd.f32 %v2136_v5, %v2483_v50  ;;  %v1212_v58 = vadd.f32 %v2583_v59, %v1176_v0  ;;  %v1246_v3 = vmax.f32 %v1214_v32, 0.0 }
 0x2c8   : > { %v1112_v10 = vpop.f32.mrf.mxu1 }
 0x2c9   : > { %v1215_v13 = vadd.f32 %v2583_v59, %v1179_v8  ;;  %v1177_v30 = vadd.f32 %v1112_v10, %v2473_v37  ;;  %v1244_v50 = vmax.f32 %v1212_v58, 0.0 }
 0x2cb   : > { %v1213_v15 = vadd.f32 %v2583_v59, %v1177_v30  ;;  %v1247_v39 = vmax.f32 %v1215_v13, 0.0 }
 0x2cd   : > { %v1245_v43 = vmax.f32 %v1213_v15, 0.0  ;;  %v1267_v34 = vpack.c.bf16 %v1247_v39, %v1246_v3 }
 0x2cf   : > { %v1266_v17 = vpack.c.bf16 %v1245_v43, %v1244_v50 }
 0x2d1   : > { %2173 = vmatprep.mubr.msk.bf16.mxu0 %vm1308_vm1, %v1266_v17 }
 0x2d2   : > { %v2139_v37 = vpop.f32.mrf.mxu1  ;;  %2174 = vmatmul.mubr.msk.bf16.gmra.mxu0 %vm1308_vm1, %v1267_v34 }
 0x2d3   : > { %v1182_v7 = vadd.f32 %v2139_v37, %v2492_v11 }
 0x2d4   : > { %v1125_v19 = vpop.f32.mrf.mxu1 }
 0x2d5   : > { %v1180_v22 = vadd.f32 %v1125_v19, %v2485_v60  ;;  %v1218_v35 = vadd.f32 %v2583_v59, %v1182_v7 }
 0x2d6   : > { %v2140_v23 = vpop.f32.mrf.mxu1 }
 0x2d7   : > { %v1183_v24 = vadd.f32 %v2140_v23, %v2497_v18  ;;  %v1216_v28 = vadd.f32 %v2583_v59, %v1180_v22  ;;  %v1250_v60 = vmax.f32 %v1218_v35, 0.0 }
 0x2d8   : > { %v1128_v62 = vpop.f32.mrf.mxu1 }
 0x2d9   : > { %v1219_v29 = vadd.f32 %v2583_v59, %v1183_v24  ;;  %v1181_v31 = vadd.f32 %v1128_v62, %v2490_v4  ;;  %v1248_v38 = vmax.f32 %v1216_v28, 0.0 }
 0x2db   : > { %v1217_v36 = vadd.f32 %v2583_v59, %v1181_v31  ;;  %v1251_v48 = vmax.f32 %v1219_v29, 0.0 }
 0x2dd   : > { %v1249_v61 = vmax.f32 %v1217_v36, 0.0  ;;  %v1269_v11 = vpack.c.bf16 %v1251_v48, %v1250_v60 }
 0x2df   : > { %v1268_v2 = vpack.c.bf16 %v1249_v61, %v1248_v38 }
 0x2e1   : > { %2177 = vmatprep.mubr.msk.bf16.mxu0 %vm1308_vm1, %v1268_v2 }
 0x2e2   : > { %v2143_v18 = vpop.f32.mrf.mxu1  ;;  %2178 = vmatmul.mubr.msk.bf16.gmra.mxu0 %vm1308_vm1, %v1269_v11 }
 0x2e3   : > { %v1186_v4 = vadd.f32 %v2143_v18, %v2506_v41  ;;  %v1282_v41 = vsub.s32 3, %v2388_v53 }
 0x2e4   : > { %v1141_v40 = vpop.f32.mrf.mxu1 }
 0x2e5   : > { %v1184_v42 = vadd.f32 %v1141_v40, %v2499_v27  ;;  %v1222_v25 = vadd.f32 %v2583_v59, %v1186_v4  ;;  %v2673_v26 = vrot.slane %v2394_v55, %v1282_v41 }
 0x2e6   : > { %v2144_v45 = vpop.f32.mrf.mxu1 }
 0x2e7   : > { %v1187_v46 = vadd.f32 %v2144_v45, %v583_v52  ;;  %v1220_v12 = vadd.f32 %v2583_v59, %v1184_v42  ;;  %v1254_v27 = vmax.f32 %v1222_v25, 0.0 }
 0x2e8   : > { %v1144_v47 = vpop.f32.mrf.mxu1 }
 0x2e9   : > { %v1223_v49 = vadd.f32 %v2583_v59, %v1187_v46  ;;  %v1185_v21 = vadd.f32 %v1144_v47, %v2504_v33  ;;  %v1252_v16 = vmax.f32 %v1220_v12, 0.0 }
 0x2eb   : > { %v1221_v51 = vadd.f32 %v2583_v59, %v1185_v21  ;;  %v1255_v54 = vmax.f32 %v1223_v49, 0.0 }
 0x2ed   : > { %v1253_v56 = vmax.f32 %v1221_v51, 0.0  ;;  %v1271_v57 = vpack.c.bf16 %v1255_v54, %v1254_v27 }
 0x2ef   : > { %v1270_v9 = vpack.c.bf16 %v1253_v56, %v1252_v16 }
 0x2f1   : > { %2181 = vmatprep.mubr.msk.bf16.mxu0 %vm1308_vm1, %v1270_v9 }
 0x2f2   : > { %2182 = vmatmul.mubr.msk.bf16.gmra.mxu0 %vm1308_vm1, %v1271_v57 }
 0x342   : > { %v2155_v20 = vpop.f32.mrf.mxu0 }
 0x343   : > { %v1400_v0 = vadd.f32 %v2155_v20, %v2673_v26 }
 0x344   : > { %v1391_v33 = vpop.f32.mrf.mxu0 }
 0x345   : > { %v1392_v59 = vadd.f32 %v1391_v33, %v2673_v26  ;;  %v1520_v58 = vmax.f32 %v1400_v0, 0.0 }
 0x346   : > { %v2156_v63 = vpop.f32.mrf.mxu0 }
 0x347   : > { %v1403_v14 = vadd.f32 %v2156_v63, %v2673_v26  ;;  %v1518_v8 = vmax.f32 %v1392_v59, 0.0 }
 0x348   : > { %v1394_v1 = vpop.f32.mrf.mxu0 }
 0x349   : > { %v1395_v5 = vadd.f32 %v1394_v1, %v2673_v26  ;;  %v1521_v6 = vmax.f32 %v1403_v14, 0.0 }
 0x34b   : > { %v1519_v10 = vmax.f32 %v1395_v5, 0.0  ;;  %v1551_v30 = vpack.c.bf16 %v1521_v6, %v1520_v58 }
 0x34d   : > { %v1550_v13 = vpack.c.bf16 %v1519_v10, %v1518_v8 }
 0x34f   : > { %2193 = vmatprep.mubr.msk.bf16.mxu1 %vm1308_vm1, %v1550_v13 }
 0x350   : > { %2194 = vmatmul.mubr.msk.bf16.vlgmr.msra.gmra.mxu1 %vm1308_vm1, %v1551_v30 }
 0x352   : > { %v2159_v55 = vpop.f32.mrf.mxu0 }
 0x353   : > { %v1416_v50 = vadd.f32 %v2159_v55, %v2673_v26 }
 0x354   : > { %v1407_v32 = vpop.f32.mrf.mxu0 }
 0x355   : > { %v1408_v15 = vadd.f32 %v1407_v32, %v2673_v26  ;;  %v1524_v19 = vmax.f32 %v1416_v50, 0.0 }
 0x356   : > { %v2160_v44 = vpop.f32.mrf.mxu0 }
 0x357   : > { %v1419_v39 = vadd.f32 %v2160_v44, %v2673_v26  ;;  %v1522_v34 = vmax.f32 %v1408_v15, 0.0 }
 0x358   : > { %v1410_v43 = vpop.f32.mrf.mxu0 }
 0x359   : > { %v1411_v3 = vadd.f32 %v1410_v43, %v2673_v26  ;;  %v1525_v17 = vmax.f32 %v1419_v39, 0.0 }
 0x35b   : > { %v1523_v37 = vmax.f32 %v1411_v3, 0.0  ;;  %v1553_v7 = vpack.c.bf16 %v1525_v17, %v1524_v19 }
 0x35d   : > { %v1552_v22 = vpack.c.bf16 %v1523_v37, %v1522_v34 }
 0x35f   : > { %2197 = vmatprep.mubr.msk.bf16.mxu1 %vm1308_vm1, %v1552_v22 }
 0x360   : > { %2198 = vmatmul.mubr.msk.bf16.gmra.mxu1 %vm1308_vm1, %v1553_v7 }
 0x362   : > { %v2163_v23 = vpop.f32.mrf.mxu0 }
 0x363   : > { %v1432_v31 = vadd.f32 %v2163_v23, %v2673_v26 }
 0x364   : > { %v1423_v24 = vpop.f32.mrf.mxu0 }
 0x365   : > { %v1424_v28 = vadd.f32 %v1423_v24, %v2673_v26  ;;  %v1528_v60 = vmax.f32 %v1432_v31, 0.0 }
 0x366   : > { %v2164_v62 = vpop.f32.mrf.mxu0 }
 0x367   : > { %v1435_v29 = vadd.f32 %v2164_v62, %v2673_v26  ;;  %v1526_v38 = vmax.f32 %v1424_v28, 0.0 }
 0x368   : > { %v1426_v35 = vpop.f32.mrf.mxu0 }
 0x369   : > { %v1427_v36 = vadd.f32 %v1426_v35, %v2673_v26  ;;  %v1529_v48 = vmax.f32 %v1435_v29, 0.0 }
 0x36b   : > { %v1527_v61 = vmax.f32 %v1427_v36, 0.0  ;;  %v1555_v11 = vpack.c.bf16 %v1529_v48, %v1528_v60 }
 0x36d   : > { %v1554_v2 = vpack.c.bf16 %v1527_v61, %v1526_v38 }
 0x36f   : > { %2201 = vmatprep.mubr.msk.bf16.mxu1 %vm1308_vm1, %v1554_v2 }
 0x370   : > { %2202 = vmatmul.mubr.msk.bf16.gmra.mxu1 %vm1308_vm1, %v1555_v11 }
 0x372   : > { %v2167_v18 = vpop.f32.mrf.mxu0 }
 0x373   : > { %v1448_v45 = vadd.f32 %v2167_v18, %v2673_v26 }
 0x374   : > { %v1439_v40 = vpop.f32.mrf.mxu0 }
 0x375   : > { %v1440_v52 = vadd.f32 %v1439_v40, %v2673_v26  ;;  %v1532_v25 = vmax.f32 %v1448_v45, 0.0 }
 0x376   : > { %v2168_v42 = vpop.f32.mrf.mxu0 }
 0x377   : > { %v1451_v4 = vadd.f32 %v2168_v42, %v2673_v26  ;;  %v1530_v49 = vmax.f32 %v1440_v52, 0.0 }
 0x378   : > { %v1442_v46 = vpop.f32.mrf.mxu0 }
 0x379   : > { %v1443_v47 = vadd.f32 %v1442_v46, %v2673_v26  ;;  %v1533_v12 = vmax.f32 %v1451_v4, 0.0 }
 0x37b   : > { %v1531_v21 = vmax.f32 %v1443_v47, 0.0  ;;  %v1557_v54 = vpack.c.bf16 %v1533_v12, %v1532_v25  ;;  %v1576_v12 = vsub.s32 4, %v2388_v53 }
 0x37d   : > { %v1556_v51 = vpack.c.bf16 %v1531_v21, %v1530_v49  ;;  %v2247_v49 = vld [vmem:[%s2841_s6] sm:$0xff] }
 0x37e   : > { %v2727_v21 = vrot.slane %v2247_v49, %v1576_v12 }
 0x37f   : > { %2205 = vmatprep.mubr.msk.bf16.mxu1 %vm1308_vm1, %v1556_v51 }
 0x380   : > { %2206 = vmatmul.mubr.msk.bf16.gmra.mxu1 %vm1308_vm1, %v1557_v54 }
 0x382   : > { %v2171_v16 = vpop.f32.mrf.mxu0 }
 0x383   : > { %v1464_v41 = vadd.f32 %v2171_v16, %v2673_v26 }
 0x384   : > { %v1455_v56 = vpop.f32.mrf.mxu0 }
 0x385   : > { %v1456_v9 = vadd.f32 %v1455_v56, %v2673_v26  ;;  %v1536_v0 = vmax.f32 %v1464_v41, 0.0 }
 0x386   : > { %v2172_v27 = vpop.f32.mrf.mxu0 }
 0x387   : > { %v1467_v57 = vadd.f32 %v2172_v27, %v2673_v26  ;;  %v1534_v59 = vmax.f32 %v1456_v9, 0.0 }
 0x388   : > { %v1458_v20 = vpop.f32.mrf.mxu0 }
 0x389   : > { %v1459_v33 = vadd.f32 %v1458_v20, %v2673_v26  ;;  %v1537_v63 = vmax.f32 %v1467_v57, 0.0 }
 0x38b   : > { %v1535_v14 = vmax.f32 %v1459_v33, 0.0  ;;  %v1559_v5 = vpack.c.bf16 %v1537_v63, %v1536_v0 }
 0x38d   : > { %v1558_v1 = vpack.c.bf16 %v1535_v14, %v1534_v59 }
 0x38f   : > { %2209 = vmatprep.mubr.msk.bf16.mxu1 %vm1308_vm1, %v1558_v1 }
 0x390   : > { %2210 = vmatmul.mubr.msk.bf16.gmra.mxu1 %vm1308_vm1, %v1559_v5 }
 0x392   : > { %v2175_v6 = vpop.f32.mrf.mxu0 }
 0x393   : > { %v1480_v30 = vadd.f32 %v2175_v6, %v2673_v26 }
 0x394   : > { %v1471_v8 = vpop.f32.mrf.mxu0 }
 0x395   : > { %v1472_v58 = vadd.f32 %v1471_v8, %v2673_v26  ;;  %v1540_v50 = vmax.f32 %v1480_v30, 0.0 }
 0x396   : > { %v2176_v10 = vpop.f32.mrf.mxu0 }
 0x397   : > { %v1483_v13 = vadd.f32 %v2176_v10, %v2673_v26  ;;  %v1538_v15 = vmax.f32 %v1472_v58, 0.0 }
 0x398   : > { %v1474_v55 = vpop.f32.mrf.mxu0 }
 0x399   : > { %v1475_v32 = vadd.f32 %v1474_v55, %v2673_v26  ;;  %v1541_v44 = vmax.f32 %v1483_v13, 0.0 }
 0x39b   : > { %v1539_v39 = vmax.f32 %v1475_v32, 0.0  ;;  %v1561_v3 = vpack.c.bf16 %v1541_v44, %v1540_v50 }
 0x39d   : > { %v1560_v43 = vpack.c.bf16 %v1539_v39, %v1538_v15 }
 0x39f   : > { %2213 = vmatprep.mubr.msk.bf16.mxu1 %vm1308_vm1, %v1560_v43 }
 0x3a0   : > { %2214 = vmatmul.mubr.msk.bf16.gmra.mxu1 %vm1308_vm1, %v1561_v3 }
 0x3a2   : > { %v2179_v17 = vpop.f32.mrf.mxu0 }
 0x3a3   : > { %v1496_v7 = vadd.f32 %v2179_v17, %v2673_v26 }
 0x3a4   : > { %v1487_v34 = vpop.f32.mrf.mxu0 }
 0x3a5   : > { %v1488_v19 = vadd.f32 %v1487_v34, %v2673_v26  ;;  %v1544_v31 = vmax.f32 %v1496_v7, 0.0 }
 0x3a6   : > { %v2180_v37 = vpop.f32.mrf.mxu0 }
 0x3a7   : > { %v1499_v22 = vadd.f32 %v2180_v37, %v2673_v26  ;;  %v1542_v28 = vmax.f32 %v1488_v19, 0.0 }
 0x3a8   : > { %v1490_v23 = vpop.f32.mrf.mxu0 }
 0x3a9   : > { %v1491_v24 = vadd.f32 %v1490_v23, %v2673_v26  ;;  %v1545_v62 = vmax.f32 %v1499_v22, 0.0 }
 0x3ab   : > { %v1543_v29 = vmax.f32 %v1491_v24, 0.0  ;;  %v1563_v36 = vpack.c.bf16 %v1545_v62, %v1544_v31 }
 0x3ad   : > { %v1562_v35 = vpack.c.bf16 %v1543_v29, %v1542_v28 }
 0x3af   : > { %2217 = vmatprep.mubr.msk.bf16.mxu1 %vm1308_vm1, %v1562_v35 }
 0x3b0   : > { %2218 = vmatmul.mubr.msk.bf16.gmra.mxu1 %vm1308_vm1, %v1563_v36 }
 0x3b2   : > { %v2183_v48 = vpop.f32.mrf.mxu0 }
 0x3b3   : > { %v1512_v11 = vadd.f32 %v2183_v48, %v2673_v26 }
 0x3b4   : > { %v1503_v38 = vpop.f32.mrf.mxu0 }
 0x3b5   : > { %v1504_v60 = vadd.f32 %v1503_v38, %v2673_v26  ;;  %v1548_v45 = vmax.f32 %v1512_v11, 0.0 }
 0x3b6   : > { %v2184_v61 = vpop.f32.mrf.mxu0 }
 0x3b7   : > { %v1515_v2 = vadd.f32 %v2184_v61, %v2673_v26  ;;  %v1546_v52 = vmax.f32 %v1504_v60, 0.0 }
 0x3b8   : > { %v1506_v18 = vpop.f32.mrf.mxu0 }
 0x3b9   : > { %v1507_v40 = vadd.f32 %v1506_v18, %v2673_v26  ;;  %v1549_v42 = vmax.f32 %v1515_v2, 0.0 }
 0x3bb   : > { %v1547_v4 = vmax.f32 %v1507_v40, 0.0  ;;  %v1565_v47 = vpack.c.bf16 %v1549_v42, %v1548_v45 }
 0x3bd   : > { %v1564_v46 = vpack.c.bf16 %v1547_v4, %v1546_v52 }
 0x3bf   : > { %2221 = vmatprep.mubr.msk.bf16.mxu1 %vm1308_vm1, %v1564_v46 }
 0x3c0   : > { %2222 = vmatmul.mubr.msk.bf16.gmra.mxu1 %vm1308_vm1, %v1565_v47 }
 0x410   : > { %v2195_v26 = vpop.f32.mrf.mxu1 }
 0x411   : > { %v1693_v53 = vadd.f32 %v2195_v26, %v2727_v21 }
 0x412   : > { %v1684_v25 = vpop.f32.mrf.mxu1 }
 0x413   : > { %1814 = vst.msk [vmem:[%s2734_s18 + $0x10] sm:$0xff] %vm1811_vm2, %v1693_v53  ;;  %v1685_v51 = vadd.f32 %v1684_v25, %v2727_v21 }
 0x414   : > { %v2196_v54 = vpop.f32.mrf.mxu1 }
 0x415   : > { %1812 = vst.msk [vmem:[%s2734_s18] sm:$0xff] %vm1811_vm2, %v1685_v51  ;;  %v1696_v16 = vadd.f32 %v2196_v54, %v2727_v21 }
 0x416   : > { %v1687_v56 = vpop.f32.mrf.mxu1 }
 0x417   : > { %1815 = vst.msk [vmem:[%s2734_s18 + $0x18] sm:$0xff] %vm1811_vm2, %v1696_v16  ;;  %v1688_v27 = vadd.f32 %v1687_v56, %v2727_v21 }
 0x419   : > { %1813 = vst.msk [vmem:[%s2734_s18 + $0x8] sm:$0xff] %vm1811_vm2, %v1688_v27 }
 0x420   : > { %v2199_v9 = vpop.f32.mrf.mxu1 }
 0x421   : > { %v1709_v57 = vadd.f32 %v2199_v9, %v2727_v21 }
 0x422   : > { %v1700_v41 = vpop.f32.mrf.mxu1 }
 0x423   : > { %1818 = vst.msk [vmem:[%s2734_s18 + $0x30] sm:$0xff] %vm1811_vm2, %v1709_v57  ;;  %v1701_v20 = vadd.f32 %v1700_v41, %v2727_v21 }
 0x424   : > { %v2200_v33 = vpop.f32.mrf.mxu1 }
 0x425   : > { %1816 = vst.msk [vmem:[%s2734_s18 + $0x20] sm:$0xff] %vm1811_vm2, %v1701_v20  ;;  %v1712_v63 = vadd.f32 %v2200_v33, %v2727_v21 }
 0x426   : > { %v1703_v59 = vpop.f32.mrf.mxu1 }
 0x427   : > { %1819 = vst.msk [vmem:[%s2734_s18 + $0x38] sm:$0xff] %vm1811_vm2, %v1712_v63  ;;  %v1704_v14 = vadd.f32 %v1703_v59, %v2727_v21 }
 0x429   : > { %1817 = vst.msk [vmem:[%s2734_s18 + $0x28] sm:$0xff] %vm1811_vm2, %v1704_v14 }
 0x430   : > { %v2203_v0 = vpop.f32.mrf.mxu1 }
 0x431   : > { %v1725_v1 = vadd.f32 %v2203_v0, %v2727_v21 }
 0x432   : > { %v1716_v5 = vpop.f32.mrf.mxu1 }
 0x433   : > { %1822 = vst.msk [vmem:[%s2734_s18 + $0x50] sm:$0xff] %vm1811_vm2, %v1725_v1  ;;  %v1717_v6 = vadd.f32 %v1716_v5, %v2727_v21 }
 0x434   : > { %v2204_v8 = vpop.f32.mrf.mxu1 }
 0x435   : > { %1820 = vst.msk [vmem:[%s2734_s18 + $0x40] sm:$0xff] %vm1811_vm2, %v1717_v6  ;;  %v1728_v10 = vadd.f32 %v2204_v8, %v2727_v21 }
 0x436   : > { %v1719_v58 = vpop.f32.mrf.mxu1 }
 0x437   : > { %1823 = vst.msk [vmem:[%s2734_s18 + $0x58] sm:$0xff] %vm1811_vm2, %v1728_v10  ;;  %v1720_v13 = vadd.f32 %v1719_v58, %v2727_v21 }
 0x439   : > { %1821 = vst.msk [vmem:[%s2734_s18 + $0x48] sm:$0xff] %vm1811_vm2, %v1720_v13 }
 0x440   : > { %v2207_v30 = vpop.f32.mrf.mxu1 }
 0x441   : > { %v1741_v55 = vadd.f32 %v2207_v30, %v2727_v21 }
 0x442   : > { %v1732_v32 = vpop.f32.mrf.mxu1 }
 0x443   : > { %1826 = vst.msk [vmem:[%s2734_s18 + $0x70] sm:$0xff] %vm1811_vm2, %v1741_v55  ;;  %v1733_v44 = vadd.f32 %v1732_v32, %v2727_v21 }
 0x444   : > { %v2208_v15 = vpop.f32.mrf.mxu1 }
 0x445   : > { %1824 = vst.msk [vmem:[%s2734_s18 + $0x60] sm:$0xff] %vm1811_vm2, %v1733_v44  ;;  %v1744_v39 = vadd.f32 %v2208_v15, %v2727_v21 }
 0x446   : > { %v1735_v50 = vpop.f32.mrf.mxu1 }
 0x447   : > { %1827 = vst.msk [vmem:[%s2734_s18 + $0x78] sm:$0xff] %vm1811_vm2, %v1744_v39  ;;  %v1736_v43 = vadd.f32 %v1735_v50, %v2727_v21 }
 0x449   : > { %1825 = vst.msk [vmem:[%s2734_s18 + $0x68] sm:$0xff] %vm1811_vm2, %v1736_v43 }
 0x450   : > { %v2211_v3 = vpop.f32.mrf.mxu1 }
 0x451   : > { %v1757_v17 = vadd.f32 %v2211_v3, %v2727_v21 }
 0x452   : > { %v1748_v34 = vpop.f32.mrf.mxu1 }
 0x453   : > { %1830 = vst.msk [vmem:[%s2734_s18 + $0x90] sm:$0xff] %vm1811_vm2, %v1757_v17  ;;  %v1749_v37 = vadd.f32 %v1748_v34, %v2727_v21 }
 0x454   : > { %v2212_v19 = vpop.f32.mrf.mxu1 }
 0x455   : > { %1828 = vst.msk [vmem:[%s2734_s18 + $0x80] sm:$0xff] %vm1811_vm2, %v1749_v37  ;;  %v1760_v22 = vadd.f32 %v2212_v19, %v2727_v21 }
 0x456   : > { %v1751_v7 = vpop.f32.mrf.mxu1 }
 0x457   : > { %1831 = vst.msk [vmem:[%s2734_s18 + $0x98] sm:$0xff] %vm1811_vm2, %v1760_v22  ;;  %v1752_v23 = vadd.f32 %v1751_v7, %v2727_v21 }
 0x459   : > { %1829 = vst.msk [vmem:[%s2734_s18 + $0x88] sm:$0xff] %vm1811_vm2, %v1752_v23 }
 0x460   : > { %v2215_v24 = vpop.f32.mrf.mxu1 }
 0x461   : > { %v1773_v62 = vadd.f32 %v2215_v24, %v2727_v21 }
 0x462   : > { %v1764_v28 = vpop.f32.mrf.mxu1 }
 0x463   : > { %1834 = vst.msk [vmem:[%s2734_s18 + $0xb0] sm:$0xff] %vm1811_vm2, %v1773_v62  ;;  %v1765_v29 = vadd.f32 %v1764_v28, %v2727_v21 }
 0x464   : > { %v2216_v31 = vpop.f32.mrf.mxu1 }
 0x465   : > { %1832 = vst.msk [vmem:[%s2734_s18 + $0xa0] sm:$0xff] %vm1811_vm2, %v1765_v29  ;;  %v1776_v35 = vadd.f32 %v2216_v31, %v2727_v21 }
 0x466   : > { %v1767_v36 = vpop.f32.mrf.mxu1 }
 0x467   : > { %1835 = vst.msk [vmem:[%s2734_s18 + $0xb8] sm:$0xff] %vm1811_vm2, %v1776_v35  ;;  %v1768_v48 = vadd.f32 %v1767_v36, %v2727_v21 }
 0x469   : > { %1833 = vst.msk [vmem:[%s2734_s18 + $0xa8] sm:$0xff] %vm1811_vm2, %v1768_v48 }
 0x470   : > { %v2219_v38 = vpop.f32.mrf.mxu1 }
 0x471   : > { %v1789_v61 = vadd.f32 %v2219_v38, %v2727_v21 }
 0x472   : > { %v1780_v60 = vpop.f32.mrf.mxu1 }
 0x473   : > { %1838 = vst.msk [vmem:[%s2734_s18 + $0xd0] sm:$0xff] %vm1811_vm2, %v1789_v61  ;;  %v1781_v2 = vadd.f32 %v1780_v60, %v2727_v21 }
 0x474   : > { %v2220_v11 = vpop.f32.mrf.mxu1 }
 0x475   : > { %1836 = vst.msk [vmem:[%s2734_s18 + $0xc0] sm:$0xff] %vm1811_vm2, %v1781_v2  ;;  %v1792_v18 = vadd.f32 %v2220_v11, %v2727_v21 }
 0x476   : > { %v1783_v40 = vpop.f32.mrf.mxu1 }
 0x477   : > { %1839 = vst.msk [vmem:[%s2734_s18 + $0xd8] sm:$0xff] %vm1811_vm2, %v1792_v18  ;;  %v1784_v42 = vadd.f32 %v1783_v40, %v2727_v21 }
 0x479   : > { %1837 = vst.msk [vmem:[%s2734_s18 + $0xc8] sm:$0xff] %vm1811_vm2, %v1784_v42 }
 0x480   : > { %v2223_v52 = vpop.f32.mrf.mxu1 }
 0x481   : > { %v1805_v4 = vadd.f32 %v2223_v52, %v2727_v21 }
 0x482   : > { %v1796_v45 = vpop.f32.mrf.mxu1 }
 0x483   : > { %1842 = vst.msk [vmem:[%s2734_s18 + $0xf0] sm:$0xff] %vm1811_vm2, %v1805_v4  ;;  %v1797_v46 = vadd.f32 %v1796_v45, %v2727_v21 }
 0x484   : > { %v2224_v47 = vpop.f32.mrf.mxu1 }
 0x485   : > { %1840 = vst.msk [vmem:[%s2734_s18 + $0xe0] sm:$0xff] %vm1811_vm2, %v1797_v46  ;;  %v1808_v12 = vadd.f32 %v2224_v47, %v2727_v21 }
 0x486   : > { %v1799_v49 = vpop.f32.mrf.mxu1 }
 0x487   : > { %1843 = vst.msk [vmem:[%s2734_s18 + $0xf8] sm:$0xff] %vm1811_vm2, %v1808_v12  ;;  %v1800_v26 = vadd.f32 %v1799_v49, %v2727_v21 }
 0x489   : > { %1841 = vst.msk [vmem:[%s2734_s18 + $0xe8] sm:$0xff] %vm1811_vm2, %v1800_v26 }
 0x48a PF: > { %s17_s24 = sadd.s32 1, %s2254_s24  }
 0x48b   : > { %p14_p4 = scmp.ge.s32.totalorder %s17_s24, 4  }
 0x48d   :  { %16 = sbr.rel (!%p14_p4) target bundleno = 1 (0x1), region = 78 }

</bundles_post_ra>
